<compile_context>
chip_gen: v7x
topology: tpu7x:2x2x1
jax: 0.10.0
libtpu: 0.0.40
codegen_flags: <defaults>
</compile_context>

<pallas_src>
import functools

import jax
import jax.numpy as jnp
from jax import lax
from jax.experimental import pallas as pl
from jax.experimental.pallas import tpu as pltpu

# ---------------- model hyper-parameters (small, consistent with the module) ----------------
OUT_DIM   = 16                     # output_dim
NUM_HEADS = 4                      # num_heads
EMB       = 32                     # emb_size (decoder d_model)
ENC_SEQ   = 16                     # encoder_seq_len (patches, without cls)
ENC_EMB   = 24                     # encoder_emb_size
D_STATE   = 64                     # ssm_state_size
D_CONV    = 4                      # conv_size
EXPAND    = 2                      # expand_factor
HEADDIM   = D_STATE // NUM_HEADS   # 16  (module: headdim = ssm_state_size // num_heads)
D_INNER   = EXPAND * EMB           # 64
D_SSM     = D_INNER                # d_ssm=None -> d_ssm = d_inner
NHEADS_M  = D_SSM // HEADDIM       # Mamba2 heads = 4
CONV_DIM  = D_SSM + 2 * D_STATE    # 192
D_IN_PROJ = 2 * D_INNER + 2 * D_STATE + NHEADS_M  # 260
EPS       = 1e-5
DEC_SEQ   = 9                      # decoder input seq (8 kept tokens + cls)
BATCH     = 2
L_FULL    = ENC_SEQ + 1            # mamba sequence length (cls re-appended at the end)

# packed small-parameter rows (one (PP_ROWS, 128) f32 operand, one row per vector)
(ROW_B_EMB, ROW_MASK, ROW_DT_BIAS, ROW_A, ROW_D_EXP,
 ROW_RMS_W, ROW_LN_W, ROW_LN_B, ROW_B_PROJ) = range(9)
PP_ROWS = 16


# ------------------------------- fused Pallas kernel -------------------------------
def _fused_decoder_kernel(
    x_ref,       # (B*DEC, ENC_EMB)   raw decoder input, batch folded along rows
    src_ref,     # (B*L, 1) int32     source column index per output token (-1 => mask token)
    w_emb_ref,   # (ENC_EMB, EMB)
    w_zdt_ref,   # (EMB, D_SSM+NH)    in_proj  [z | dt]   (bias=False)
    w_xbc_ref,   # (EMB, CONV_DIM)    in_proj  [x | B | C]
    cwb_ref,     # (D_CONV+1, CONV_DIM) depthwise conv weights (rows 0..K-1) + bias (row K)
    w_out_ref,   # (D_SSM, EMB)       out_proj (bias=False)
    w_proj_ref,  # (EMB, OUT_DIM)     final projection
    pp_ref,      # (PP_ROWS, 128)     packed small parameter vectors
    o_ref,       # (B*L, OUT_DIM)
    *, batch, dec_len, enc_seq, d_ssm, d_state, nheads, headdim, d_conv, eps,
):
    f32 = jnp.float32
    L = enc_seq + 1
    BL = batch * L
    BD = batch * dec_len
    emb = w_emb_ref.shape[1]
    conv_dim = w_xbc_ref.shape[1]
    out_dim = o_ref.shape[1]

    def prow(r, n):                                  # (1, n) packed-param row
        return pp_ref[r:r + 1, :n]

    # ---- embedding Linear (folded over batch) ----
    xe = (jnp.dot(x_ref[...], w_emb_ref[...], preferred_element_type=f32)
          + prow(ROW_B_EMB, emb))                                        # (B*DEC, EMB)

    # ---- token assembly: one-hot gather + mask-token fill + cls append ----
    src = src_ref[...]                                                   # (BL, 1) int32
    col = lax.broadcasted_iota(jnp.int32, (BL, BD), 1)
    gmat = (src == col).astype(f32)                                      # (BL, BD) one-hot
    mask_flag = (src < 0).astype(f32)                                    # (BL, 1)
    xt = (jnp.dot(gmat, xe, preferred_element_type=f32)
          + mask_flag * prow(ROW_MASK, emb))                             # (BL, EMB)

    # ---- fused in_proj: [z | dt] and [x | B | C] ----
    zdt = jnp.dot(xt, w_zdt_ref[...], preferred_element_type=f32)        # (BL, d_ssm + NH)
    z = zdt[:, :d_ssm]
    dt0 = zdt[:, d_ssm:d_ssm + nheads]
    xbc = jnp.dot(xt, w_xbc_ref[...], preferred_element_type=f32)        # (BL, conv_dim)

    # position within each folded sequence (for conv masking + block-diag causal mask)
    row = lax.broadcasted_iota(jnp.int32, (BL, 1), 0)
    t_mod = row
    for b in range(1, batch):                                            # static unroll
        t_mod = t_mod - L * (row >= b * L).astype(jnp.int32)

    # ---- causal depthwise conv1d + SiLU on the fused 192-wide stream ----
    up = jnp.concatenate([jnp.zeros((d_conv - 1, conv_dim), f32), xbc], axis=0)
    acc = jnp.broadcast_to(cwb_ref[d_conv:d_conv + 1, :], (BL, conv_dim))
    for k in range(d_conv):                                              # static unroll
        shift = d_conv - 1 - k
        term = up[k:k + BL, :] * cwb_ref[k:k + 1, :]
        if shift > 0:
            # zero any contribution reaching back across the sequence boundary
            term = term * (t_mod >= shift).astype(f32)
        acc = acc + term
    xbc_c = acc * jax.nn.sigmoid(acc)                                    # SiLU
    x_ssm = xbc_c[:, :d_ssm]                                             # (BL, 64)
    b_ssm = xbc_c[:, d_ssm:d_ssm + d_state]                              # (BL, 64)
    c_ssm = xbc_c[:, d_ssm + d_state:]                                   # (BL, 64)

    # ---- SSD, single-chunk quadratic form, factored (one big matmul, no per-head loop) ----
    dt = jax.nn.softplus(dt0 + prow(ROW_DT_BIAS, nheads))                # (BL, NH)
    a_neg = prow(ROW_A, nheads)                                          # (1, NH) = -exp(A_log)
    dtA = dt * a_neg                                                     # (BL, NH), < 0

    r_io = lax.broadcasted_iota(jnp.int32, (BL, BL), 0)
    c_io = lax.broadcasted_iota(jnp.int32, (BL, BL), 1)
    dm = r_io - c_io
    tril = jnp.logical_and(dm >= 0, dm <= t_mod).astype(f32)             # block-diag causal

    cumA = jnp.dot(tril, dtA, preferred_element_type=f32)                # per-seq incl. cumsum

    # per-head stabilizer: cumA is monotone decreasing within each sequence, so its minimum
    # sits on the last row of each sequence; shifting by m/2 keeps exp(+/-) finite and the
    # shift cancels exactly inside the causal products.
    m = cumA[L - 1:L, :]
    for b in range(1, batch):                                            # static unroll
        m = jnp.minimum(m, cumA[(b + 1) * L - 1:(b + 1) * L, :])
    m = 0.5 * m                                                          # (1, NH)

    c_dec = jnp.exp(m - cumA) * dt                                       # (BL, NH)
    r_dec = jnp.exp(cumA - m)                                            # (BL, NH)

    # head -> channel expansion via a tiny 0/1 matmul (no jnp.repeat relayout)
    hr = lax.broadcasted_iota(jnp.int32, (nheads, d_ssm), 0)
    hc = lax.broadcasted_iota(jnp.int32, (nheads, d_ssm), 1)
    cd = hc - hr * headdim
    expand = jnp.logical_and(cd >= 0, cd < headdim).astype(f32)          # (NH, d_ssm)
    c_exp = jnp.dot(c_dec, expand, preferred_element_type=f32)           # (BL, d_ssm)
    r_exp = jnp.dot(r_dec, expand, preferred_element_type=f32)           # (BL, d_ssm)

    # CB[t, s] = C_t . B_s  (shared across heads, ngroups = 1); cross-batch zeroed by tril
    cb = lax.dot_general(c_ssm, b_ssm, (((1,), (1,)), ((), ())),
                         preferred_element_type=f32)                     # (BL, BL)
    tmat = tril * cb
    y = (r_exp * jnp.dot(tmat, c_exp * x_ssm, preferred_element_type=f32)
         + prow(ROW_D_EXP, d_ssm) * x_ssm)                               # (BL, d_ssm)

    # ---- gated RMSNorm (norm_before_gate=False): rmsnorm(y * silu(z)) * w ----
    yg = y * (z * jax.nn.sigmoid(z))
    var = jnp.mean(yg * yg, axis=-1, keepdims=True)
    y_n = yg * lax.rsqrt(var + eps) * prow(ROW_RMS_W, d_ssm)

    # ---- out_proj ----
    h_out = jnp.dot(y_n, w_out_ref[...], preferred_element_type=f32)     # (BL, EMB)

    # ---- decoder LayerNorm (cls rows computed too; dropped in the wrapper) ----
    mu = jnp.mean(h_out, axis=-1, keepdims=True)
    xm = h_out - mu
    v = jnp.mean(xm * xm, axis=-1, keepdims=True)
    h_ln = xm * lax.rsqrt(v + eps) * prow(ROW_LN_W, emb) + prow(ROW_LN_B, emb)

    # ---- final projection ----
    out = (jnp.dot(h_ln, w_proj_ref[...], preferred_element_type=f32)
           + prow(ROW_B_PROJ, out_dim))
    o_ref[...] = out.astype(o_ref.dtype)


# ------------------------------- one-time parameter prep -------------------------------
def prepare_params(p):
    """Fuse / pack raw module parameters into kernel-ready operands (run ONCE, not per call)."""
    w_in = p["w_in"]
    w_z = w_in[:, :D_SSM]
    w_xbc = w_in[:, D_SSM:2 * D_SSM + 2 * D_STATE]              # x | B | C  -> (EMB, 192)
    w_dt = w_in[:, 2 * D_SSM + 2 * D_STATE:]                    # (EMB, NH)
    w_zdt = jnp.concatenate([w_z, w_dt], axis=1)                # z | dt     -> (EMB, 68)

    cwb = jnp.concatenate([p["conv_w"], p["conv_b"][None, :]], axis=0)   # (D_CONV+1, 192)

    pp = jnp.zeros((PP_ROWS, 128), jnp.float32)

    def setrow(arr, r, v):
        v = jnp.asarray(v, jnp.float32).reshape(-1)
        return arr.at[r, :v.shape[0]].set(v)

    pp = setrow(pp, ROW_B_EMB, p["b_emb"])
    pp = setrow(pp, ROW_MASK, p["mask_token"])
    pp = setrow(pp, ROW_DT_BIAS, p["dt_bias"])
    pp = setrow(pp, ROW_A, -jnp.exp(p["A_log"]))                # pre-negate/exp
    pp = setrow(pp, ROW_D_EXP, jnp.repeat(p["D"], HEADDIM))     # pre-expand per head
    pp = setrow(pp, ROW_RMS_W, p["rms_w"])
    pp = setrow(pp, ROW_LN_W, p["ln_w"])
    pp = setrow(pp, ROW_LN_B, p["ln_b"])
    pp = setrow(pp, ROW_B_PROJ, p["b_proj"])

    return dict(w_emb=p["w_emb"], w_zdt=w_zdt, w_xbc=w_xbc, cwb=cwb,
                w_out=p["w_out"], w_proj=p["w_proj"], pp=pp)


# ------------------------------- wrapper -------------------------------
@jax.jit
def timae_mamba_decoder_forward(x, ids_restore, kp):
    bs, dec_len, enc_emb = x.shape
    L = ENC_SEQ + 1
    BL = bs * L

    # fold batch into the sublane (row) dimension
    x_fold = x.reshape(bs * dec_len, enc_emb)

    # per-call source-index column for the gather (tiny int math on B*L elements):
    #   ids < dec_len-1  -> kept token  at folded row b*dec_len + ids
    #   ids >= dec_len-1 -> mask token  (src = -1)
    #   last row of each sequence      -> cls token (folded row b*dec_len + dec_len-1)
    ids = ids_restore.astype(jnp.int32)
    boff = (jnp.arange(bs, dtype=jnp.int32) * dec_len)[:, None]
    src_body = jnp.where(ids < dec_len - 1, ids + boff, -1)              # (bs, ENC_SEQ)
    src_cls = boff + (dec_len - 1)                                       # (bs, 1)
    src = jnp.concatenate([src_body, src_cls], axis=1).reshape(BL, 1)    # (B*L, 1)

    kernel = functools.partial(
        _fused_decoder_kernel,
        batch=bs, dec_len=dec_len, enc_seq=ENC_SEQ, d_ssm=D_SSM, d_state=D_STATE,
        nheads=NHEADS_M, headdim=HEADDIM, d_conv=D_CONV, eps=EPS,
    )

    def full(shape):
        return pl.BlockSpec(shape, lambda i: (0,) * len(shape))

    out_fold = pl.pallas_call(
        kernel,
        out_shape=jax.ShapeDtypeStruct((BL, OUT_DIM), jnp.float32),
        grid=(1,),                                       # single step, batch folded in rows
        in_specs=[
            full((bs * dec_len, enc_emb)),               # x (folded)
            full((BL, 1)),                               # src column (int32)
            full((ENC_EMB, EMB)),                        # w_emb
            full((EMB, D_SSM + NHEADS_M)),               # w_zdt
            full((EMB, CONV_DIM)),                       # w_xbc
            full((D_CONV + 1, CONV_DIM)),                # conv weight + bias row
            full((D_SSM, EMB)),                          # w_out
            full((EMB, OUT_DIM)),                        # w_proj
            full((PP_ROWS, 128)),                        # packed small params
        ],
        out_specs=full((BL, OUT_DIM)),
        compiler_params=pltpu.CompilerParams(dimension_semantics=("arbitrary",)),
    )(x_fold, src, kp["w_emb"], kp["w_zdt"], kp["w_xbc"], kp["cwb"],
      kp["w_out"], kp["w_proj"], kp["pp"])

    # drop the trailing cls token of each sequence (tiny XLA slice on 2 KiB)
    return out_fold.reshape(bs, L, OUT_DIM)[:, :ENC_SEQ, :]


# --------------------------- pure-JAX reference (sequential SSM scan) ---------------------------
def assemble_tokens(xe, ids_restore, mask_token):
    bs, dec_len, e = xe.shape
    n_mask = ENC_SEQ - dec_len + 1
    mask_tokens = jnp.broadcast_to(mask_token, (bs, n_mask, e))
    x_ = jnp.concatenate([xe[:, :-1, :], mask_tokens], axis=1)
    x_ = jnp.take_along_axis(x_, ids_restore[:, :, None], axis=1)
    x_ = jnp.concatenate([x_, xe[:, -1:, :]], axis=1)
    return x_


def _mamba2_ref(xseq, p):
    L = xseq.shape[0]
    zxbcdt = xseq @ p["w_in"]
    z = zxbcdt[:, :D_SSM]
    xBC = zxbcdt[:, D_SSM:D_SSM + CONV_DIM]
    dt = zxbcdt[:, D_SSM + CONV_DIM:]

    xp = jnp.concatenate([jnp.zeros((D_CONV - 1, CONV_DIM), jnp.float32), xBC], axis=0)
    acc = jnp.zeros((L, CONV_DIM), jnp.float32) + p["conv_b"][None, :]
    for k in range(D_CONV):
        acc = acc + xp[k:k + L, :] * p["conv_w"][k][None, :]
    xBC = jax.nn.silu(acc)

    x_ssm = xBC[:, :D_SSM]
    B = xBC[:, D_SSM:D_SSM + D_STATE]
    C = xBC[:, D_SSM + D_STATE:]

    dt = jax.nn.softplus(dt + p["dt_bias"][None, :])
    A = -jnp.exp(p["A_log"])
    xh = x_ssm.reshape(L, NHEADS_M, HEADDIM)

    def step(hstate, inp):
        dt_t, x_t, B_t, C_t = inp
        dA = jnp.exp(dt_t * A)
        hstate = dA[:, None, None] * hstate + (dt_t[:, None] * x_t)[:, :, None] * B_t[None, None, :]
        y_t = jnp.einsum("hpn,n->hp", hstate, C_t) + p["D"][:, None] * x_t
        return hstate, y_t

    h0 = jnp.zeros((NHEADS_M, HEADDIM, D_STATE), jnp.float32)
    _, ys = lax.scan(step, h0, (dt, xh, B, C))
    y = ys.reshape(L, D_SSM)

    yg = y * jax.nn.silu(z)
    y = yg * lax.rsqrt(jnp.mean(yg * yg, axis=-1, keepdims=True) + EPS) * p["rms_w"][None, :]
    return y @ p["w_out"]


def decoder_forward_ref(x, ids_restore, p):
    bs, dec_len, _ = x.shape
    xe = x @ p["w_emb"] + p["b_emb"][None, None, :]
    x_ = assemble_tokens(xe, ids_restore, p["mask_token"])
    outs = []
    for b in range(bs):
        y = _mamba2_ref(x_[b], p)
        mu = jnp.mean(y, -1, keepdims=True)
        xc = y - mu
        v = jnp.mean(xc * xc, -1, keepdims=True)
        y = xc * lax.rsqrt(v + EPS) * p["ln_w"][None, :] + p["ln_b"][None, :]
        y = y @ p["w_proj"] + p["b_proj"][None, :]
        outs.append(y)
    return jnp.stack(outs, 0)[:, :-1, :]


# --------------------------------------- main ---------------------------------------
def make_params(key):
    ks = jax.random.split(key, 16)

    def nrm(k, shape, scale=0.05):
        return scale * jax.random.normal(k, shape, jnp.float32)

    return dict(
        w_emb=nrm(ks[0], (ENC_EMB, EMB)),
        b_emb=nrm(ks[1], (EMB,)),
        mask_token=nrm(ks[2], (1, 1, EMB)),
        w_in=nrm(ks[3], (EMB, D_IN_PROJ)),
        conv_w=nrm(ks[4], (D_CONV, CONV_DIM), 0.2),
        conv_b=nrm(ks[5], (CONV_DIM,), 0.1),
        dt_bias=nrm(ks[6], (NHEADS_M,), 0.5),
        A_log=jnp.log(jnp.linspace(1.0, 4.0, NHEADS_M).astype(jnp.float32)),
        D=jnp.ones((NHEADS_M,), jnp.float32) + nrm(ks[7], (NHEADS_M,), 0.1),
        rms_w=jnp.ones((D_SSM,), jnp.float32) + nrm(ks[8], (D_SSM,), 0.1),
        w_out=nrm(ks[9], (D_SSM, EMB)),
        ln_w=jnp.ones((EMB,), jnp.float32) + nrm(ks[10], (EMB,), 0.1),
        ln_b=nrm(ks[11], (EMB,), 0.1),
        w_proj=nrm(ks[12], (EMB, OUT_DIM)),
        b_proj=nrm(ks[13], (OUT_DIM,), 0.1),
    )


if __name__ == "__main__":
    key = jax.random.PRNGKey(0)
    kp_key, kx, kperm = jax.random.split(key, 3)
    params = make_params(kp_key)
    kernel_params = prepare_params(params)          # ONE-TIME packing, outside the jitted forward

    x = jax.random.normal(kx, (BATCH, DEC_SEQ, ENC_EMB), jnp.float32)
    ids_restore = jnp.stack(
        [jax.random.permutation(jax.random.fold_in(kperm, b), ENC_SEQ) for b in range(BATCH)],
        axis=0,
    ).astype(jnp.int32)

    out = timae_mamba_decoder_forward(x, ids_restore, kernel_params)
    out = jax.block_until_ready(out)
    assert out.shape == (BATCH, ENC_SEQ, OUT_DIM), out.shape

    ref = jax.block_until_ready(decoder_forward_ref(x, ids_restore, params))
    max_err = float(jnp.max(jnp.abs(out - ref)))
    assert max_err < 1e-3, f"mismatch vs JAX reference: {max_err}"

    print("KERNEL_OK")
</pallas_src>

<mosaic_0001>
module attributes {stable_mosaic.version = 11 : i64} {
  func.func @_fused_decoder_kernel(%arg0: i32, %arg1: memref<18x24xf32, #tpu.memory_space<vmem>>, %arg2: memref<34x1xi32, #tpu.memory_space<vmem>>, %arg3: memref<24x32xf32, #tpu.memory_space<vmem>>, %arg4: memref<32x68xf32, #tpu.memory_space<vmem>>, %arg5: memref<32x192xf32, #tpu.memory_space<vmem>>, %arg6: memref<5x192xf32, #tpu.memory_space<vmem>>, %arg7: memref<64x32xf32, #tpu.memory_space<vmem>>, %arg8: memref<32x16xf32, #tpu.memory_space<vmem>>, %arg9: memref<16x128xf32, #tpu.memory_space<vmem>>, %arg10: memref<34x16xf32, #tpu.memory_space<vmem>>) attributes {dimension_semantics = [#tpu.dimension_semantics<arbitrary>], iteration_bounds = array<i64: 1>, scalar_prefetch = 0 : i64, scratch_operands = 0 : i64, tpu.core_type = #tpu.core_type<tc>, window_params = [{pipeline_mode = #tpu.pipeline_mode<synchronous>, transform_indices = @transform_0, window_bounds = array<i64: 18, 24>}, {pipeline_mode = #tpu.pipeline_mode<synchronous>, transform_indices = @transform_1, window_bounds = array<i64: 34, 1>}, {pipeline_mode = #tpu.pipeline_mode<synchronous>, transform_indices = @transform_2, window_bounds = array<i64: 24, 32>}, {pipeline_mode = #tpu.pipeline_mode<synchronous>, transform_indices = @transform_3, window_bounds = array<i64: 32, 68>}, {pipeline_mode = #tpu.pipeline_mode<synchronous>, transform_indices = @transform_4, window_bounds = array<i64: 32, 192>}, {pipeline_mode = #tpu.pipeline_mode<synchronous>, transform_indices = @transform_5, window_bounds = array<i64: 5, 192>}, {pipeline_mode = #tpu.pipeline_mode<synchronous>, transform_indices = @transform_6, window_bounds = array<i64: 64, 32>}, {pipeline_mode = #tpu.pipeline_mode<synchronous>, transform_indices = @transform_7, window_bounds = array<i64: 32, 16>}, {pipeline_mode = #tpu.pipeline_mode<synchronous>, transform_indices = @transform_8, window_bounds = array<i64: 16, 128>}, {pipeline_mode = #tpu.pipeline_mode<synchronous>, transform_indices = @transform_9, window_bounds = array<i64: 34, 16>}]} {
    %c0 = arith.constant 0 : index
    %c0_0 = arith.constant 0 : index
    %0 = vector.load %arg1[%c0, %c0_0] : memref<18x24xf32, #tpu.memory_space<vmem>>, vector<18x24xf32>
    %c0_1 = arith.constant 0 : index
    %c0_2 = arith.constant 0 : index
    %1 = vector.load %arg3[%c0_1, %c0_2] : memref<24x32xf32, #tpu.memory_space<vmem>>, vector<24x32xf32>
    %cst = arith.constant dense<0.000000e+00> : vector<18x32xf32>
    %2 = tpu.matmul %0, %1, %cst {dimension_numbers = #tpu.dot_dimension_numbers<[1], [0], [0], [1], [0, 0, 1, 1], [], []>} : vector<18x24xf32>, vector<24x32xf32>, vector<18x32xf32> -> vector<18x32xf32>
    %c0_3 = arith.constant 0 : index
    %c0_4 = arith.constant 0 : index
    %3 = vector.load %arg9[%c0_3, %c0_4] : memref<16x128xf32, #tpu.memory_space<vmem>>, vector<1x32xf32>
    %4 = vector.broadcast %3 : vector<1x32xf32> to vector<18x32xf32>
    %5 = arith.addf %2, %4 : vector<18x32xf32>
    %c0_5 = arith.constant 0 : index
    %c0_6 = arith.constant 0 : index
    %6 = vector.load %arg2[%c0_5, %c0_6] : memref<34x1xi32, #tpu.memory_space<vmem>>, vector<34x1xi32>
    %7 = tpu.iota {dimensions = array<i32: 1>} : vector<34x18xi32>
    %8 = vector.broadcast %6 : vector<34x1xi32> to vector<34x18xi32>
    %9 = arith.cmpi eq, %8, %7 : vector<34x18xi32>
    %10 = arith.extui %9 : vector<34x18xi1> to vector<34x18xi32>
    %11 = arith.sitofp %10 : vector<34x18xi32> to vector<34x18xf32>
    %c0_i32 = arith.constant 0 : i32
    %12 = vector.broadcast %c0_i32 : i32 to vector<34x1xi32>
    %13 = arith.cmpi slt, %6, %12 : vector<34x1xi32>
    %14 = arith.extui %13 : vector<34x1xi1> to vector<34x1xi32>
    %15 = arith.sitofp %14 : vector<34x1xi32> to vector<34x1xf32>
    %cst_7 = arith.constant dense<0.000000e+00> : vector<34x32xf32>
    %16 = tpu.matmul %11, %5, %cst_7 {dimension_numbers = #tpu.dot_dimension_numbers<[1], [0], [0], [1], [0, 0, 1, 1], [], []>} : vector<34x18xf32>, vector<18x32xf32>, vector<34x32xf32> -> vector<34x32xf32>
    %c1 = arith.constant 1 : index
    %c0_8 = arith.constant 0 : index
    %17 = vector.load %arg9[%c1, %c0_8] : memref<16x128xf32, #tpu.memory_space<vmem>>, vector<1x32xf32>
    %18 = vector.broadcast %15 : vector<34x1xf32> to vector<34x32xf32>
    %19 = vector.broadcast %17 : vector<1x32xf32> to vector<34x32xf32>
    %20 = arith.mulf %18, %19 : vector<34x32xf32>
    %21 = arith.addf %16, %20 : vector<34x32xf32>
    %c0_9 = arith.constant 0 : index
    %c0_10 = arith.constant 0 : index
    %22 = vector.load %arg4[%c0_9, %c0_10] : memref<32x68xf32, #tpu.memory_space<vmem>>, vector<32x68xf32>
    %cst_11 = arith.constant dense<0.000000e+00> : vector<34x68xf32>
    %23 = tpu.matmul %21, %22, %cst_11 {dimension_numbers = #tpu.dot_dimension_numbers<[1], [0], [0], [1], [0, 0, 1, 1], [], []>} : vector<34x32xf32>, vector<32x68xf32>, vector<34x68xf32> -> vector<34x68xf32>
    %24 = vector.extract_strided_slice %23 {offsets = [0, 0], sizes = [34, 64], strides = [1, 1]} : vector<34x68xf32> to vector<34x64xf32>
    %25 = vector.extract_strided_slice %23 {offsets = [0, 64], sizes = [34, 4], strides = [1, 1]} : vector<34x68xf32> to vector<34x4xf32>
    %c0_12 = arith.constant 0 : index
    %c0_13 = arith.constant 0 : index
    %26 = vector.load %arg5[%c0_12, %c0_13] : memref<32x192xf32, #tpu.memory_space<vmem>>, vector<32x192xf32>
    %cst_14 = arith.constant dense<0.000000e+00> : vector<34x192xf32>
    %27 = tpu.matmul %21, %26, %cst_14 {dimension_numbers = #tpu.dot_dimension_numbers<[1], [0], [0], [1], [0, 0, 1, 1], [], []>} : vector<34x32xf32>, vector<32x192xf32>, vector<34x192xf32> -> vector<34x192xf32>
    %28 = tpu.iota {dimensions = array<i32: 0>} : vector<34x1xi32>
    %c17_i32 = arith.constant 17 : i32
    %29 = vector.broadcast %c17_i32 : i32 to vector<34x1xi32>
    %30 = arith.cmpi sge, %28, %29 : vector<34x1xi32>
    %31 = arith.extui %30 : vector<34x1xi1> to vector<34x1xi32>
    %c17_i32_15 = arith.constant 17 : i32
    %32 = vector.broadcast %c17_i32_15 : i32 to vector<34x1xi32>
    %33 = arith.muli %32, %31 : vector<34x1xi32>
    %34 = arith.subi %28, %33 : vector<34x1xi32>
    %cst_16 = arith.constant 0.000000e+00 : f32
    %35 = vector.broadcast %cst_16 : f32 to vector<3x192xf32>
    %36 = tpu.concatenate %35, %27 in 0 : vector<3x192xf32>, vector<34x192xf32> -> vector<37x192xf32>
    %c4 = arith.constant 4 : index
    %c0_17 = arith.constant 0 : index
    %37 = vector.load %arg6[%c4, %c0_17] : memref<5x192xf32, #tpu.memory_space<vmem>>, vector<1x192xf32>
    %38 = vector.shape_cast %37 : vector<1x192xf32> to vector<1x192xf32>
    %39 = vector.broadcast %38 : vector<1x192xf32> to vector<34x192xf32>
    %40 = vector.extract_strided_slice %36 {offsets = [0, 0], sizes = [34, 192], strides = [1, 1]} : vector<37x192xf32> to vector<34x192xf32>
    %c0_18 = arith.constant 0 : index
    %c0_19 = arith.constant 0 : index
    %41 = vector.load %arg6[%c0_18, %c0_19] : memref<5x192xf32, #tpu.memory_space<vmem>>, vector<1x192xf32>
    %42 = vector.broadcast %41 : vector<1x192xf32> to vector<34x192xf32>
    %43 = arith.mulf %40, %42 : vector<34x192xf32>
    %c3_i32 = arith.constant 3 : i32
    %44 = vector.broadcast %c3_i32 : i32 to vector<34x1xi32>
    %45 = arith.cmpi sge, %34, %44 : vector<34x1xi32>
    %46 = arith.extui %45 : vector<34x1xi1> to vector<34x1xi32>
    %47 = arith.sitofp %46 : vector<34x1xi32> to vector<34x1xf32>
    %48 = vector.broadcast %47 : vector<34x1xf32> to vector<34x192xf32>
    %49 = arith.mulf %43, %48 : vector<34x192xf32>
    %50 = arith.addf %39, %49 : vector<34x192xf32>
    %51 = vector.extract_strided_slice %36 {offsets = [1, 0], sizes = [34, 192], strides = [1, 1]} : vector<37x192xf32> to vector<34x192xf32>
    %c1_20 = arith.constant 1 : index
    %c0_21 = arith.constant 0 : index
    %52 = vector.load %arg6[%c1_20, %c0_21] : memref<5x192xf32, #tpu.memory_space<vmem>>, vector<1x192xf32>
    %53 = vector.broadcast %52 : vector<1x192xf32> to vector<34x192xf32>
    %54 = arith.mulf %51, %53 : vector<34x192xf32>
    %c2_i32 = arith.constant 2 : i32
    %55 = vector.broadcast %c2_i32 : i32 to vector<34x1xi32>
    %56 = arith.cmpi sge, %34, %55 : vector<34x1xi32>
    %57 = arith.extui %56 : vector<34x1xi1> to vector<34x1xi32>
    %58 = arith.sitofp %57 : vector<34x1xi32> to vector<34x1xf32>
    %59 = vector.broadcast %58 : vector<34x1xf32> to vector<34x192xf32>
    %60 = arith.mulf %54, %59 : vector<34x192xf32>
    %61 = arith.addf %50, %60 : vector<34x192xf32>
    %62 = vector.extract_strided_slice %36 {offsets = [2, 0], sizes = [34, 192], strides = [1, 1]} : vector<37x192xf32> to vector<34x192xf32>
    %c2 = arith.constant 2 : index
    %c0_22 = arith.constant 0 : index
    %63 = vector.load %arg6[%c2, %c0_22] : memref<5x192xf32, #tpu.memory_space<vmem>>, vector<1x192xf32>
    %64 = vector.broadcast %63 : vector<1x192xf32> to vector<34x192xf32>
    %65 = arith.mulf %62, %64 : vector<34x192xf32>
    %c1_i32 = arith.constant 1 : i32
    %66 = vector.broadcast %c1_i32 : i32 to vector<34x1xi32>
    %67 = arith.cmpi sge, %34, %66 : vector<34x1xi32>
    %68 = arith.extui %67 : vector<34x1xi1> to vector<34x1xi32>
    %69 = arith.sitofp %68 : vector<34x1xi32> to vector<34x1xf32>
    %70 = vector.broadcast %69 : vector<34x1xf32> to vector<34x192xf32>
    %71 = arith.mulf %65, %70 : vector<34x192xf32>
    %72 = arith.addf %61, %71 : vector<34x192xf32>
    %73 = vector.extract_strided_slice %36 {offsets = [3, 0], sizes = [34, 192], strides = [1, 1]} : vector<37x192xf32> to vector<34x192xf32>
    %c3 = arith.constant 3 : index
    %c0_23 = arith.constant 0 : index
    %74 = vector.load %arg6[%c3, %c0_23] : memref<5x192xf32, #tpu.memory_space<vmem>>, vector<1x192xf32>
    %75 = vector.broadcast %74 : vector<1x192xf32> to vector<34x192xf32>
    %76 = arith.mulf %73, %75 : vector<34x192xf32>
    %77 = arith.addf %72, %76 : vector<34x192xf32>
    %78 = arith.negf %77 : vector<34x192xf32>
    %79 = math.exp %78 : vector<34x192xf32>
    %cst_24 = arith.constant 1.000000e+00 : f32
    %80 = vector.broadcast %cst_24 : f32 to vector<34x192xf32>
    %81 = arith.addf %80, %79 : vector<34x192xf32>
    %82 = arith.divf %80, %81 : vector<34x192xf32>
    %83 = arith.mulf %77, %82 : vector<34x192xf32>
    %84 = vector.extract_strided_slice %83 {offsets = [0, 0], sizes = [34, 64], strides = [1, 1]} : vector<34x192xf32> to vector<34x64xf32>
    %85 = vector.extract_strided_slice %83 {offsets = [0, 64], sizes = [34, 64], strides = [1, 1]} : vector<34x192xf32> to vector<34x64xf32>
    %86 = vector.extract_strided_slice %83 {offsets = [0, 128], sizes = [34, 64], strides = [1, 1]} : vector<34x192xf32> to vector<34x64xf32>
    %c2_25 = arith.constant 2 : index
    %c0_26 = arith.constant 0 : index
    %87 = vector.load %arg9[%c2_25, %c0_26] : memref<16x128xf32, #tpu.memory_space<vmem>>, vector<1x4xf32>
    %88 = vector.broadcast %87 : vector<1x4xf32> to vector<34x4xf32>
    %89 = arith.addf %25, %88 : vector<34x4xf32>
    %cst_27 = arith.constant 0.000000e+00 : f32
    %90 = vector.broadcast %cst_27 : f32 to vector<34x4xf32>
    %91 = arith.maximumf %89, %90 : vector<34x4xf32>
    %92 = vector.broadcast %cst_27 : f32 to vector<34x4xf32>
    %93 = arith.subf %89, %92 : vector<34x4xf32>
    %94 = arith.cmpf one, %93, %93 : vector<34x4xf32>
    %95 = vector.broadcast %cst_27 : f32 to vector<34x4xf32>
    %96 = arith.addf %89, %95 : vector<34x4xf32>
    %97 = math.absf %93 : vector<34x4xf32>
    %cst_28 = arith.constant 0.000000e+00 : f32
    %98 = vector.broadcast %cst_28 : f32 to vector<34x4xf32>
    %99 = arith.subf %98, %97 : vector<34x4xf32>
    %100 = math.exp %99 : vector<34x4xf32>
    %101 = math.log1p %100 : vector<34x4xf32>
    %102 = arith.addf %91, %101 : vector<34x4xf32>
    %103 = arith.select %94, %96, %102 : vector<34x4xi1>, vector<34x4xf32>
    %c3_29 = arith.constant 3 : index
    %c0_30 = arith.constant 0 : index
    %104 = vector.load %arg9[%c3_29, %c0_30] : memref<16x128xf32, #tpu.memory_space<vmem>>, vector<1x4xf32>
    %105 = vector.broadcast %104 : vector<1x4xf32> to vector<34x4xf32>
    %106 = arith.mulf %103, %105 : vector<34x4xf32>
    %107 = tpu.iota {dimensions = array<i32: 0>} : vector<34x34xi32>
    %108 = tpu.iota {dimensions = array<i32: 1>} : vector<34x34xi32>
    %109 = arith.subi %107, %108 : vector<34x34xi32>
    %c0_i32_31 = arith.constant 0 : i32
    %110 = vector.broadcast %c0_i32_31 : i32 to vector<34x34xi32>
    %111 = arith.cmpi sge, %109, %110 : vector<34x34xi32>
    %112 = vector.broadcast %34 : vector<34x1xi32> to vector<34x34xi32>
    %113 = arith.cmpi sle, %109, %112 : vector<34x34xi32>
    %114 = arith.andi %111, %113 : vector<34x34xi1>
    %115 = arith.extui %114 : vector<34x34xi1> to vector<34x34xi32>
    %116 = arith.sitofp %115 : vector<34x34xi32> to vector<34x34xf32>
    %cst_32 = arith.constant dense<0.000000e+00> : vector<34x4xf32>
    %117 = tpu.matmul %116, %106, %cst_32 {dimension_numbers = #tpu.dot_dimension_numbers<[1], [0], [0], [1], [0, 0, 1, 1], [], []>} : vector<34x34xf32>, vector<34x4xf32>, vector<34x4xf32> -> vector<34x4xf32>
    %118 = vector.extract_strided_slice %117 {offsets = [16, 0], sizes = [1, 4], strides = [1, 1]} : vector<34x4xf32> to vector<1x4xf32>
    %119 = vector.extract_strided_slice %117 {offsets = [33, 0], sizes = [1, 4], strides = [1, 1]} : vector<34x4xf32> to vector<1x4xf32>
    %120 = arith.minimumf %118, %119 : vector<1x4xf32>
    %cst_33 = arith.constant 5.000000e-01 : f32
    %121 = vector.broadcast %cst_33 : f32 to vector<1x4xf32>
    %122 = arith.mulf %121, %120 : vector<1x4xf32>
    %123 = vector.broadcast %122 : vector<1x4xf32> to vector<34x4xf32>
    %124 = arith.subf %123, %117 : vector<34x4xf32>
    %125 = math.exp %124 : vector<34x4xf32>
    %126 = arith.mulf %125, %103 : vector<34x4xf32>
    %127 = vector.broadcast %122 : vector<1x4xf32> to vector<34x4xf32>
    %128 = arith.subf %117, %127 : vector<34x4xf32>
    %129 = math.exp %128 : vector<34x4xf32>
    %130 = tpu.iota {dimensions = array<i32: 0>} : vector<4x64xi32>
    %131 = tpu.iota {dimensions = array<i32: 1>} : vector<4x64xi32>
    %c16_i32 = arith.constant 16 : i32
    %132 = vector.broadcast %c16_i32 : i32 to vector<4x64xi32>
    %133 = arith.muli %130, %132 : vector<4x64xi32>
    %134 = arith.subi %131, %133 : vector<4x64xi32>
    %c0_i32_34 = arith.constant 0 : i32
    %135 = vector.broadcast %c0_i32_34 : i32 to vector<4x64xi32>
    %136 = arith.cmpi sge, %134, %135 : vector<4x64xi32>
    %c16_i32_35 = arith.constant 16 : i32
    %137 = vector.broadcast %c16_i32_35 : i32 to vector<4x64xi32>
    %138 = arith.cmpi slt, %134, %137 : vector<4x64xi32>
    %139 = arith.andi %136, %138 : vector<4x64xi1>
    %140 = arith.extui %139 : vector<4x64xi1> to vector<4x64xi32>
    %141 = arith.sitofp %140 : vector<4x64xi32> to vector<4x64xf32>
    %cst_36 = arith.constant dense<0.000000e+00> : vector<34x64xf32>
    %142 = tpu.matmul %126, %141, %cst_36 {dimension_numbers = #tpu.dot_dimension_numbers<[1], [0], [0], [1], [0, 0, 1, 1], [], []>} : vector<34x4xf32>, vector<4x64xf32>, vector<34x64xf32> -> vector<34x64xf32>
    %cst_37 = arith.constant dense<0.000000e+00> : vector<34x64xf32>
    %143 = tpu.matmul %129, %141, %cst_37 {dimension_numbers = #tpu.dot_dimension_numbers<[1], [0], [0], [1], [0, 0, 1, 1], [], []>} : vector<34x4xf32>, vector<4x64xf32>, vector<34x64xf32> -> vector<34x64xf32>
    %cst_38 = arith.constant dense<0.000000e+00> : vector<34x34xf32>
    %144 = tpu.matmul %86, %85, %cst_38 {dimension_numbers = #tpu.dot_dimension_numbers<[1], [1], [0], [0], [0, 0, 1, 0], [], []>} : vector<34x64xf32>, vector<34x64xf32>, vector<34x34xf32> -> vector<34x34xf32>
    %145 = arith.mulf %116, %144 : vector<34x34xf32>
    %146 = arith.mulf %142, %84 : vector<34x64xf32>
    %cst_39 = arith.constant dense<0.000000e+00> : vector<34x64xf32>
    %147 = tpu.matmul %145, %146, %cst_39 {dimension_numbers = #tpu.dot_dimension_numbers<[1], [0], [0], [1], [0, 0, 1, 1], [], []>} : vector<34x34xf32>, vector<34x64xf32>, vector<34x64xf32> -> vector<34x64xf32>
    %148 = arith.mulf %143, %147 : vector<34x64xf32>
    %c4_40 = arith.constant 4 : index
    %c0_41 = arith.constant 0 : index
    %149 = vector.load %arg9[%c4_40, %c0_41] : memref<16x128xf32, #tpu.memory_space<vmem>>, vector<1x64xf32>
    %150 = vector.broadcast %149 : vector<1x64xf32> to vector<34x64xf32>
    %151 = arith.mulf %150, %84 : vector<34x64xf32>
    %152 = arith.addf %148, %151 : vector<34x64xf32>
    %153 = arith.negf %24 : vector<34x64xf32>
    %154 = math.exp %153 : vector<34x64xf32>
    %cst_42 = arith.constant 1.000000e+00 : f32
    %155 = vector.broadcast %cst_42 : f32 to vector<34x64xf32>
    %156 = arith.addf %155, %154 : vector<34x64xf32>
    %157 = arith.divf %155, %156 : vector<34x64xf32>
    %158 = arith.mulf %24, %157 : vector<34x64xf32>
    %159 = arith.mulf %152, %158 : vector<34x64xf32>
    %160 = arith.mulf %159, %159 : vector<34x64xf32>
    %cst_43 = arith.constant dense<0.000000e+00> : vector<34xf32>
    %161 = vector.multi_reduction <add>, %160, %cst_43 [1] : vector<34x64xf32> to vector<34xf32>
    %162 = vector.shape_cast %161 : vector<34xf32> to vector<34x1xf32>
    %cst_44 = arith.constant 6.400000e+01 : f32
    %163 = vector.broadcast %cst_44 : f32 to vector<34x1xf32>
    %164 = arith.divf %162, %163 : vector<34x1xf32>
    %cst_45 = arith.constant 9.99999974E-6 : f32
    %165 = vector.broadcast %cst_45 : f32 to vector<34x1xf32>
    %166 = arith.addf %164, %165 : vector<34x1xf32>
    %167 = math.rsqrt %166 : vector<34x1xf32>
    %168 = vector.broadcast %167 : vector<34x1xf32> to vector<34x64xf32>
    %169 = arith.mulf %159, %168 : vector<34x64xf32>
    %c5 = arith.constant 5 : index
    %c0_46 = arith.constant 0 : index
    %170 = vector.load %arg9[%c5, %c0_46] : memref<16x128xf32, #tpu.memory_space<vmem>>, vector<1x64xf32>
    %171 = vector.broadcast %170 : vector<1x64xf32> to vector<34x64xf32>
    %172 = arith.mulf %169, %171 : vector<34x64xf32>
    %c0_47 = arith.constant 0 : index
    %c0_48 = arith.constant 0 : index
    %173 = vector.load %arg7[%c0_47, %c0_48] : memref<64x32xf32, #tpu.memory_space<vmem>>, vector<64x32xf32>
    %cst_49 = arith.constant dense<0.000000e+00> : vector<34x32xf32>
    %174 = tpu.matmul %172, %173, %cst_49 {dimension_numbers = #tpu.dot_dimension_numbers<[1], [0], [0], [1], [0, 0, 1, 1], [], []>} : vector<34x64xf32>, vector<64x32xf32>, vector<34x32xf32> -> vector<34x32xf32>
    %cst_50 = arith.constant dense<0.000000e+00> : vector<34xf32>
    %175 = vector.multi_reduction <add>, %174, %cst_50 [1] : vector<34x32xf32> to vector<34xf32>
    %176 = vector.shape_cast %175 : vector<34xf32> to vector<34x1xf32>
    %cst_51 = arith.constant 3.200000e+01 : f32
    %177 = vector.broadcast %cst_51 : f32 to vector<34x1xf32>
    %178 = arith.divf %176, %177 : vector<34x1xf32>
    %179 = vector.broadcast %178 : vector<34x1xf32> to vector<34x32xf32>
    %180 = arith.subf %174, %179 : vector<34x32xf32>
    %181 = arith.mulf %180, %180 : vector<34x32xf32>
    %cst_52 = arith.constant dense<0.000000e+00> : vector<34xf32>
    %182 = vector.multi_reduction <add>, %181, %cst_52 [1] : vector<34x32xf32> to vector<34xf32>
    %183 = vector.shape_cast %182 : vector<34xf32> to vector<34x1xf32>
    %cst_53 = arith.constant 3.200000e+01 : f32
    %184 = vector.broadcast %cst_53 : f32 to vector<34x1xf32>
    %185 = arith.divf %183, %184 : vector<34x1xf32>
    %cst_54 = arith.constant 9.99999974E-6 : f32
    %186 = vector.broadcast %cst_54 : f32 to vector<34x1xf32>
    %187 = arith.addf %185, %186 : vector<34x1xf32>
    %188 = math.rsqrt %187 : vector<34x1xf32>
    %189 = vector.broadcast %188 : vector<34x1xf32> to vector<34x32xf32>
    %190 = arith.mulf %180, %189 : vector<34x32xf32>
    %c6 = arith.constant 6 : index
    %c0_55 = arith.constant 0 : index
    %191 = vector.load %arg9[%c6, %c0_55] : memref<16x128xf32, #tpu.memory_space<vmem>>, vector<1x32xf32>
    %192 = vector.broadcast %191 : vector<1x32xf32> to vector<34x32xf32>
    %193 = arith.mulf %190, %192 : vector<34x32xf32>
    %c7 = arith.constant 7 : index
    %c0_56 = arith.constant 0 : index
    %194 = vector.load %arg9[%c7, %c0_56] : memref<16x128xf32, #tpu.memory_space<vmem>>, vector<1x32xf32>
    %195 = vector.broadcast %194 : vector<1x32xf32> to vector<34x32xf32>
    %196 = arith.addf %193, %195 : vector<34x32xf32>
    %c0_57 = arith.constant 0 : index
    %c0_58 = arith.constant 0 : index
    %197 = vector.load %arg8[%c0_57, %c0_58] : memref<32x16xf32, #tpu.memory_space<vmem>>, vector<32x16xf32>
    %cst_59 = arith.constant dense<0.000000e+00> : vector<34x16xf32>
    %198 = tpu.matmul %196, %197, %cst_59 {dimension_numbers = #tpu.dot_dimension_numbers<[1], [0], [0], [1], [0, 0, 1, 1], [], []>} : vector<34x32xf32>, vector<32x16xf32>, vector<34x16xf32> -> vector<34x16xf32>
    %c8 = arith.constant 8 : index
    %c0_60 = arith.constant 0 : index
    %199 = vector.load %arg9[%c8, %c0_60] : memref<16x128xf32, #tpu.memory_space<vmem>>, vector<1x16xf32>
    %200 = vector.broadcast %199 : vector<1x16xf32> to vector<34x16xf32>
    %201 = arith.addf %198, %200 : vector<34x16xf32>
    %c0_61 = arith.constant 0 : index
    %c0_62 = arith.constant 0 : index
    %202 = vector.load %arg10[%c0_61, %c0_62] : memref<34x16xf32, #tpu.memory_space<vmem>>, vector<34x16xf32>
    tpu.vector_store %arg10[%c0_61, %c0_62], %201 {strides = array<i32>} : memref<34x16xf32, #tpu.memory_space<vmem>>, vector<34x16xf32>,
    return
  }
  func.func @transform_0(%arg0: i32) -> (i32, i32) {
    %c0_i32 = arith.constant 0 : i32
    %c0_i32_0 = arith.constant 0 : i32
    %c0_i32_1 = arith.constant 0 : i32
    return %c0_i32, %c0_i32_0 : i32, i32
  }
  func.func @transform_1(%arg0: i32) -> (i32, i32) {
    %c0_i32 = arith.constant 0 : i32
    %c0_i32_0 = arith.constant 0 : i32
    %c0_i32_1 = arith.constant 0 : i32
    return %c0_i32, %c0_i32_0 : i32, i32
  }
  func.func @transform_2(%arg0: i32) -> (i32, i32) {
    %c0_i32 = arith.constant 0 : i32
    %c0_i32_0 = arith.constant 0 : i32
    %c0_i32_1 = arith.constant 0 : i32
    return %c0_i32, %c0_i32_0 : i32, i32
  }
  func.func @transform_3(%arg0: i32) -> (i32, i32) {
    %c0_i32 = arith.constant 0 : i32
    %c0_i32_0 = arith.constant 0 : i32
    %c0_i32_1 = arith.constant 0 : i32
    return %c0_i32, %c0_i32_0 : i32, i32
  }
  func.func @transform_4(%arg0: i32) -> (i32, i32) {
    %c0_i32 = arith.constant 0 : i32
    %c0_i32_0 = arith.constant 0 : i32
    %c0_i32_1 = arith.constant 0 : i32
    return %c0_i32, %c0_i32_0 : i32, i32
  }
  func.func @transform_5(%arg0: i32) -> (i32, i32) {
    %c0_i32 = arith.constant 0 : i32
    %c0_i32_0 = arith.constant 0 : i32
    %c0_i32_1 = arith.constant 0 : i32
    return %c0_i32, %c0_i32_0 : i32, i32
  }
  func.func @transform_6(%arg0: i32) -> (i32, i32) {
    %c0_i32 = arith.constant 0 : i32
    %c0_i32_0 = arith.constant 0 : i32
    %c0_i32_1 = arith.constant 0 : i32
    return %c0_i32, %c0_i32_0 : i32, i32
  }
  func.func @transform_7(%arg0: i32) -> (i32, i32) {
    %c0_i32 = arith.constant 0 : i32
    %c0_i32_0 = arith.constant 0 : i32
    %c0_i32_1 = arith.constant 0 : i32
    return %c0_i32, %c0_i32_0 : i32, i32
  }
  func.func @transform_8(%arg0: i32) -> (i32, i32) {
    %c0_i32 = arith.constant 0 : i32
    %c0_i32_0 = arith.constant 0 : i32
    %c0_i32_1 = arith.constant 0 : i32
    return %c0_i32, %c0_i32_0 : i32, i32
  }
  func.func @transform_9(%arg0: i32) -> (i32, i32) {
    %c0_i32 = arith.constant 0 : i32
    %c0_i32_0 = arith.constant 0 : i32
    %c0_i32_1 = arith.constant 0 : i32
    return %c0_i32, %c0_i32_0 : i32, i32
  }
}

</mosaic_0001>

<bundles_post_ra>
// kernel: timae_mamba_decoder_forward.1
= control target key start
LH: loop header
LB: loop body
LE: loop exit
PB: predicated region body
PF: predicated region fallthrough
CT: control target
= control target key end

     0   :  { %v4153_v0 = vmov 0.0|0.0   ;;  %vm2937_vm0 = vmmov 0   ;;  %v4151_v3 = vmov 0.0   ;;  %v2939_v5 = vmov 0   ;;  %s2940_s12 = smov 64   ;;  %s4141_s2 = inlined_call_operand.vmem [shape: f32[24,32], index: 2, kind: input, shape index: {}]   ;;  %s4142_s1 = inlined_call_operand.vmem [shape: s32[34,1], index: 1, kind: input, shape index: {}]   ;;  %s4143_s0 = inlined_call_operand.vmem [shape: f32[18,24], index: 0, kind: input, shape index: {}]   ;;  %s4144_s3 = inlined_call_operand.vmem [shape: f32[32,68], index: 3, kind: input, shape index: {}]   ;;  %s4145_s8 = inlined_call_operand.vmem [shape: f32[16,128], index: 8, kind: input, shape index: {}]   ;;  %s4146_s4 = inlined_call_operand.vmem [shape: f32[32,192], index: 4, kind: input, shape index: {}]   ;;  %s4147_s5 = inlined_call_operand.vmem [shape: f32[5,192], index: 5, kind: input, shape index: {}]   ;;  %s4148_s6 = inlined_call_operand.vmem [shape: f32[64,32], index: 6, kind: input, shape index: {}]   ;;  %s4149_s7 = inlined_call_operand.vmem [shape: f32[32,16], index: 7, kind: input, shape index: {}]   ;;  %s4150_s9 = inlined_call_operand.vmem [shape: f32[34,16], index: 9, kind: output, shape index: {}]  }
   0x1   :  { %2726 = vmatprep.subr.bf16.mxu0 %v4153_v0  ;;  %v35_v1 = vld [vmem:[%s4141_s2] sm:$0xff]  ;;  %v36_v2 = vld [vmem:[%s4141_s2 + $0x8] sm:$0xff]  ;;  %2510 = vmatprep.mubr.msk.f32.mxu0 %vm2937_vm0, %v4151_v3  ;;  %v135_v7 = vld [vmem:[%s4142_s1 + $0x10] sm:$0xff]  ;;  %vm43_vm1 = vcmask 195584   ;;  %v138_v23 = vlaneseq  ;;  %vm236_vm8 = vcmask 1041408   ;;  %vm220_vm9 = vcmask 146432  }
   0x2   :  { %v2727_v4 = vpack.c.bf16 %v36_v2, %v35_v1  ;;  %2784 = vmatprep.subr.bf16.mxu1 %v4153_v0  ;;  %2516 = vmatprep.mubr.msk.f32.mxu1 %vm2937_vm0, %v4151_v3  ;;  %v133_v6 = vld [vmem:[%s4142_s1] sm:$0xff]  ;;  %v37_v8 = vld [vmem:[%s4141_s2 + $0x10] sm:$0xff]  ;;  %v134_v11 = vld [vmem:[%s4142_s1 + $0x8] sm:$0xff]  ;;  %vm172_vm4 = vcmp.lt.s32.totalorder %v135_v7, 0  ;;  %vm334_vm14 = vcmask 261120  }
   0x3   :  { %2794 = vset.pattern.permute.xlu0 %v2939_v5  ;;  %2795 = vset.pattern.permute.xlu1 %v2939_v5  ;;  %v32_v9 = vld [vmem:[%s4143_s0] sm:$0xff]  ;;  %v34_v10 = vld [vmem:[%s4143_s0 + $0x10] sm:$0x3]  ;;  %v136_v12 = vld [vmem:[%s4142_s1 + $0x18] sm:$0xff]  ;;  %vm170_vm2 = vcmp.lt.s32.totalorder %v133_v6, 0  ;;  %vm171_vm3 = vcmp.lt.s32.totalorder %v134_v11, 0 }
   0x4   :  { %2728 = vmatpush3.bf16.msra.mxu0 %v2727_v4  ;;  %2786 = vmatpush3.bf16.msra.mxu1 %v2727_v4  ;;  %v33_v13 = vld [vmem:[%s4143_s0 + $0x8] sm:$0xff]  ;;  %v137_v14 = vld [vmem:[%s4142_s1 + $0x20] sm:$0x3]  ;;  %v2311_v15 = vsel %vm170_vm2, 1.0, %v4151_v3  ;;  %v2312_v16 = vsel %vm171_vm3, 1.0, %v4151_v3  ;;  %vm173_vm5 = vcmp.lt.s32.totalorder %v136_v12, 0 }
   0x5   :  { %2508 = vmatprep.subr.mxu0 %v4151_v3  ;;  %2785 = vmatprep.subr.mxu1 %v4151_v3  ;;  %v2313_v17 = vsel %vm172_vm4, 1.0, %v4151_v3  ;;  %vm174_vm6 = vcmp.lt.s32.totalorder %v137_v14, 0  ;;  %v2314_v18 = vsel %vm173_vm5, 1.0, %v4151_v3  ;;  %v330_v20 = vld [vmem:[%s4144_s3] sm:$0xff]  ;;  %v331_v21 = vld [vmem:[%s4144_s3 + $0x8] sm:$0xff]  ;;  %v3062_v29 = vand.u32 127, %v138_v23 }
   0x6   :  { %141 = vperm.xlu0 %2794, %v133_v6   ;;  %147 = vperm.xlu1 %2795, %v135_v7   ;;  %v2315_v19 = vsel %vm174_vm6, 1.0, %v4151_v3  ;;  %v2733_v22 = vpack.c.bf16 %v331_v21, %v330_v20  ;;  %v2302_v28 = vld [vmem:[%s4145_s8] ss:$0 sm:$0xff]  ;;  %v441_v36 = vld [vmem:[%s4146_s4 + $0x8] sm:$0xff]  ;;  %v443_v37 = vld [vmem:[%s4146_s4 + $0x18] sm:$0xff]  ;;  %vm579_vm3 = vcmask 1042432  }
   0x7   :  { %4181 = vst [vmem:[#allocation2_spill] sm:$0xff] %v3062_v29  ;;  %v440_v38 = vld [vmem:[%s4146_s4] sm:$0xff]  ;;  %v442_v39 = vld [vmem:[%s4146_s4 + $0x10] sm:$0xff]  ;;  %v445_v41 = vld [vmem:[%s4146_s4 + $0x28] sm:$0xff]  ;;  %v2738_v43 = vpack.c.bf16 %v443_v37, %v441_v36 }
   0x8   :  { %2509 = vmatpush3.msra.mxu0 %v37_v8  ;;  %2787 = vmatpush3.msra.mxu1 %v37_v8  ;;  %v447_v42 = vld [vmem:[%s4146_s4 + $0x38] sm:$0xff]  ;;  %v2740_v45 = vpack.c.bf16 %v442_v39, %v440_v38  ;;  %v332_v55 = vld [vmem:[%s4144_s3 + $0x10] sm:$0xff]  ;;  %v444_v57 = vld [vmem:[%s4146_s4 + $0x20] sm:$0xff] }
   0x9   :  { %2511 = vmatmul.mubr.msk.f32.vlgmr.msra.gmra.mrb[0].mxu0 %vm43_vm1, %v32_v9  ;;  %2517 = vmatmul.mubr.msk.f32.vlgmr.msra.gmra.mrb[0].mxu1 %vm43_vm1, %v34_v10  ;;  %v2742_v46 = vpack.c.bf16 %v447_v42, %v445_v41  ;;  %v333_v56 = vld [vmem:[%s4144_s3 + $0x18] sm:$0xff]  ;;  %v446_v59 = vld [vmem:[%s4146_s4 + $0x30] sm:$0xff]  ;;  %v2355_v61 = vld [vmem:[%s4145_s8 + $0x2] ss:$0 sm:$0xff] }
   0xa   :  { %2513 = vmatprep.mubr.msk.f32.mxu0 %vm2937_vm0, %v4151_v3  ;;  %144 = vperm.xlu0 %2794, %v134_v11   ;;  %v2736_v58 = vpack.c.bf16 %v333_v56, %v332_v55  ;;  %v2744_v60 = vpack.c.bf16 %v446_v59, %v444_v57  ;;  %v2356_v62 = vld [vmem:[%s4145_s8 + $0x3] ss:$0 sm:$0xff]  ;;  %v2316_v63 = vld [vmem:[%s4145_s8 + $0x1] ss:$0 sm:$0xff] }
   0xb   :  { %150 = vperm.xlu1 %2795, %v136_v12   ;;  %2729 = vmatprep.subr.bf16.mxu1 %v4153_v0  ;;  %v2338_v36 = vld [vmem:[%s4147_s5 + $0x1] ss:$8 sm:$0x3]  ;;  %v2344_v42 = vld [vmem:[%s4147_s5 + $0x3] ss:$8 sm:$0x3] }
   0xc   :  { %2525 = vmatprep.mubr.msk.f32.mxu1 %vm2937_vm0, %v4151_v3  ;;  %2732 = vmatprep.subr.bf16.mxu0 %v4153_v0 }
   0xd   :  { %2514 = vmatmul.mubr.msk.f32.gmra.mrb[2].mxu0 %vm43_vm1, %v33_v13 }
   0xe   :  { %153 = vperm.xlu0 %2794, %v137_v14   ;;  %2548 = vmatprep.mubr.msk.f32.mxu0 %vm2937_vm0, %v4151_v3 }
   0xf   :  { %188 = vperm.xlu1 %2795, %v2311_v15   ;;  %2734 = vmatpush3.bf16.msra.mxu0 %v2733_v22 }
  0x10   :  { %2735 = vmatprep.subr.bf16.mxu0 %v4153_v0 }
  0x12   :  { %193 = vperm.xlu0 %2794, %v2312_v16  }
  0x13   :  { %198 = vperm.xlu1 %2795, %v2313_v17   ;;  %2737 = vmatpush3.bf16.msra.mxu0 %v2736_v58 }
  0x14   :  { %2746 = vmatprep.subr.bf16.mxu0 %v4153_v0 }
  0x16   :  { %203 = vperm.xlu0 %2794, %v2314_v18  }
  0x17   :  { %208 = vperm.xlu1 %2795, %v2315_v19  }
  0x1a   :  { %1061 = vrot.lane.b32.xlu0 %v2355_v61, %s2940_s12 }
  0x1b   :  { %1165 = vrot.lane.b32.xlu1 %v2356_v62, %s2940_s12 }
  0x85   :  { %v142_v34 = vpop.permute.xlu0 %141  ;;  %v148_v48 = vpop.permute.xlu1 %147 }
  0x86   :  { %vm155_vm7 = vcmp.eq.s32.totalorder %v142_v34, %v3062_v29  ;;  %vm157_vm11 = vcmp.eq.s32.totalorder %v148_v48, %v3062_v29 }
  0x87   :  { %v2306_v44 = vsel %vm155_vm7, 1.0, %v4151_v3  ;;  %v2308_v50 = vsel %vm157_vm11, 1.0, %v4151_v3  ;;  %vm723_vm7 = vcmask 1040384   ;;  %vm758_vm11 = vcmask 1046528  }
  0x89   :  { %v145_v47 = vpop.permute.xlu0 %144 }
  0x8a   :  { %vm156_vm10 = vcmp.eq.s32.totalorder %v145_v47, %v3062_v29  ;;  %v151_v51 = vpop.permute.xlu1 %150 }
  0x8b   :  { %v2307_v49 = vsel %vm156_vm10, 1.0, %v4151_v3  ;;  %vm158_vm12 = vcmp.eq.s32.totalorder %v151_v51, %v3062_v29  ;;  %vm946_vm10 = vcmask 1044480  }
  0x8c   :  { %v2309_v53 = vsel %vm158_vm12, 1.0, %v4151_v3  ;;  %vm874_vm12 = vcmask 1045504  }
  0x8d   :  { %v154_v52 = vpop.permute.xlu0 %153 }
  0x8e   :  { %vm159_vm13 = vcmp.eq.s32.totalorder %v154_v52, %v3062_v29  ;;  %v189_v1 = vpop.permute.xlu1 %188 }
  0x8f   :  { %v2310_v54 = vsel %vm159_vm13, 1.0, %v4151_v3  ;;  %v215_v2 = vmul.f32 %v2316_v63, %v189_v1 }
  0x91   :  { %v194_v8 = vpop.permute.xlu0 %193 }
  0x92   :  { %v216_v9 = vmul.f32 %v2316_v63, %v194_v8  ;;  %v199_v13 = vpop.permute.xlu1 %198 }
  0x93   :  { %v217_v14 = vmul.f32 %v2316_v63, %v199_v13 }
  0x95   :  { %v204_v15 = vpop.permute.xlu0 %203 }
  0x96   :  { %v218_v19 = vmul.f32 %v2316_v63, %v204_v15  ;;  %v209_v20 = vpop.permute.xlu1 %208 }
  0xdc   :  { %v119_v24 = vpop.f32.mrb[0].mxu0  ;;  %v129_v25 = vpop.f32.mrb[0].mxu1 }
  0xdd   :  { %v2512_v26 = vpop.f32.mrb[1].mxu0  ;;  %v2518_v27 = vpop.f32.mrb[1].mxu1  ;;  %v120_v31 = vadd.f32 %v2302_v28, %v119_v24  ;;  %v130_v40 = vadd.f32 %v2302_v28, %v129_v25  ;;  %v219_v25 = vmul.f32 %v2316_v63, %v209_v20 }
  0xde   :  { %v3238_v63 = vpop.permute.xlu0 %1061 }
  0xe0   :  { %v124_v30 = vpop.f32.mrb[2].mxu0 }
  0xe1   :  { %v125_v32 = vadd.f32 %v2302_v28, %v124_v30  ;;  %v2515_v33 = vpop.f32.mrb[3].mxu0  ;;  %v3160_v30 = vshrl.u32 %v138_v23, 7  ;;  %v623_v23 = vld [vmem:[%s4147_s5] ss:$8 sm:$0x3] }
  0xe3   :  { %v2730_v35 = vpack.c.bf16 %v125_v32, %v120_v31  ;;  %4182 = vst [vmem:[#allocation3_spill] sm:$0xff] %v3160_v30  ;;  %v3163_v31 = vadd.s32 16, %v3160_v30  ;;  %v3191_v41 = vsub.s32 0, %v3160_v30  ;;  %vm703_vm4 = vcmp.ge.s32.totalorder %v3160_v30, 2 }
  0xe4   :  { %vm820_vm5 = vcmp.ge.s32.totalorder %v3160_v30, 1  ;;  %vm645_vm6 = vcmp.ge.s32.totalorder %v3160_v30, 3 }
  0xe5   :  { %2731 = vmatpush3.bf16.msra.mxu1 %v2730_v35  ;;  %4183 = vst [vmem:[#allocation4_spill] sm:$0xff] %v3163_v31  ;;  %vm551_vm15 = vcmp.ge.s32.totalorder %v3163_v31, 17  ;;  %4186 = vst [vmem:[#allocation7_spill] sm:$0xff] %v3191_v41  ;;  %v3220_v55 = vrot.slane %v623_v23, %v3191_v41  ;;  %v3228_v59 = vsel %vm645_vm6, 1.0, %v4151_v3  ;;  %v2342_v61 = vsel %vm820_vm5, 1.0, %v4151_v3 }
  0xe6   :  { %2523 = vmatprep.subr.mxu1 %v4151_v3  ;;  %v556_v32 = vsel %vm551_vm15, 1, %v2939_v5  ;;  %v619_v5 = vsub.s32 1, %v3160_v30  ;;  %v3255_v13 = vrot.slane %v2338_v36, %v3191_v41  ;;  %v840_v20 = vrot.slane %v2342_v61, 6 }
  0xe7   :  { %v561_v33 = vmul.u32 17, %v556_v32 }
  0xe8   :  { %v3205_v47 = vrot.slane %v623_v23, %v619_v5  ;;  %v3207_v48 = vrot.slane %v2338_v36, %v619_v5 }
  0xe9   :  { %2524 = vmatpush3.msk.msra.mxu1 %vm236_vm8, %v130_v40  ;;  %v3168_v34 = vsub.s32 %v3163_v31, %v561_v33  ;;  %v2341_v40 = vld [vmem:[%s4147_s5 + $0x2] ss:$8 sm:$0x3] }
  0xea   :  { %2526 = vmatmul.mubr.msk.f32.vlgmr.msra.gmra.mrb[2].mxu1 %vm220_vm9, %v2306_v44  ;;  %2739 = vmatprep.subr.bf16.mxu1 %v2738_v43  ;;  %v3258_v15 = vrot.slane %v2341_v40, %v3191_v41 }
  0xeb   :  { %2528 = vmatprep.mubr.msk.f32.mxu1 %vm2937_vm0, %v4151_v3  ;;  %2741 = vmatpush1.bf16.msra.mxu1 %v2740_v45  ;;  %4184 = vst [vmem:[#allocation5_spill] sm:$0xff] %v3168_v34  ;;  %vm705_vm1 = vcmp.ge.s32.totalorder %v3168_v34, 2  ;;  %vm822_vm2 = vcmp.ge.s32.totalorder %v3168_v34, 1 }
  0xec   :  { %2743 = vmatprep.subr.bf16.mxu1 %v2742_v46  ;;  %v3176_v35 = vsel %vm705_vm1, 1.0, %v4151_v3  ;;  %v3183_v37 = vsel %vm822_vm2, 1.0, %v4151_v3  ;;  %v2335_v46 = vld [vmem:[%s4147_s5 + $0x4] ss:$8 sm:$0x3] }
  0xed   :  { %v3236_v62 = vrot.slane %v2335_v46, %v619_v5 }
  0xee   :  { %2529 = vmatmul.mubr.msk.f32.gmra.mrb[4].mxu1 %vm220_vm9, %v2307_v49  ;;  %v3209_v49 = vrot.slane %v2341_v40, %v619_v5 }
  0xef   :  { %2531 = vmatprep.mubr.msk.f32.mxu1 %vm2937_vm0, %v4151_v3  ;;  %2745 = vmatpush1.bf16.msra.mxu1 %v2744_v60  ;;  %v2339_v60 = vsel %vm703_vm4, 1.0, %v4151_v3 }
  0xf0   :  { %2588 = vmatprep.subr.mxu1 %v4151_v3 }
  0xf2   :  { %2532 = vmatmul.mubr.msk.f32.gmra.mrb[6].mxu1 %vm220_vm9, %v2308_v50  ;;  %v3211_v50 = vrot.slane %v2344_v42, %v619_v5 }
  0xf3   :  { %2534 = vmatprep.mubr.msk.f32.mxu1 %vm2937_vm0, %v4151_v3 }
  0xf6   :  { %2535 = vmatmul.mubr.msk.f32.gmra.mrb[8].mxu1 %vm220_vm9, %v2309_v53  ;;  %v727_v53 = vrot.slane %v3176_v35, 7 }
  0xf7   :  { %2537 = vmatprep.mubr.msk.f32.mxu1 %vm2937_vm0, %v4151_v3 }
  0xfa   :  { %2538 = vmatmul.mubr.msk.f32.gmra.mrb[10].mxu1 %vm220_vm9, %v2310_v54  ;;  %v843_v54 = vrot.slane %v3183_v37, 6  ;;  %vm647_vm9 = vcmp.ge.s32.totalorder %v3168_v34, 3 }
  0xfb   :  { %512 = vmatprep.mubr.f32.mxu1 %v4151_v3  ;;  %v3294_v36 = vsel %vm647_vm9, 1.0, %v4151_v3 }
 0x1bd   :  { %v306_v4 = vpop.f32.mrb[2].mxu1 }
 0x1be   :  { %v307_v6 = vadd.f32 %v306_v4, %v215_v2  ;;  %v2527_v7 = vpop.f32.mrb[3].mxu1 }
 0x1c0   :  { %2549 = vmatmul.mubr.msk.f32.vlgmr.msra.gmra.mrb[4].mxu0 %vm334_vm14, %v307_v6  ;;  %2328 = vmatmul.mubr.msk.f32.vlgmr.msra.gmra.mrb[12].mxu1 %vm334_vm14, %v307_v6  ;;  %v2941_v6 = vmov 1.0  }
 0x1c1   :  { %v311_v10 = vpop.f32.mrb[4].mxu1  ;;  %2551 = vmatprep.mubr.msk.f32.mxu0 %vm2937_vm0, %v4151_v3  ;;  %518 = vmatprep.mubr.f32.mxu1 %v4151_v3  ;;  %v3243_v7 = vrot.slane %v2941_v6, 7 }
 0x1c2   :  { %v312_v11 = vadd.f32 %v311_v10, %v216_v9  ;;  %v2530_v12 = vpop.f32.mrb[5].mxu1  ;;  %v3248_v10 = vrot.slane %v2941_v6, 6 }
 0x1c4   :  { %2552 = vmatmul.mubr.msk.f32.gmra.mrb[6].mxu0 %vm334_vm14, %v312_v11  ;;  %2329 = vmatmul.mubr.msk.f32.gmra.mrb[14].mxu1 %vm334_vm14, %v312_v11  ;;  %v3304_v40 = vsel %vm236_vm8, %v3248_v10, %v843_v54 }
 0x1c5   :  { %v316_v16 = vpop.f32.mrb[6].mxu1  ;;  %2554 = vmatprep.mubr.msk.f32.mxu0 %vm2937_vm0, %v4151_v3  ;;  %524 = vmatprep.mubr.f32.mxu1 %v4151_v3 }
 0x1c6   :  { %v317_v17 = vadd.f32 %v316_v16, %v217_v14  ;;  %v2533_v18 = vpop.f32.mrb[7].mxu1  ;;  %v724_v14 = vrot.slane %v2339_v60, 7 }
 0x1c8   :  { %2555 = vmatmul.mubr.msk.f32.gmra.mrb[8].mxu0 %vm334_vm14, %v317_v17  ;;  %2330 = vmatmul.mubr.msk.f32.gmra.mrb[16].mxu1 %vm334_vm14, %v317_v17 }
 0x1c9   :  { %v321_v21 = vpop.f32.mrb[8].mxu1  ;;  %2557 = vmatprep.mubr.msk.f32.mxu0 %vm2937_vm0, %v4151_v3  ;;  %530 = vmatprep.mubr.f32.mxu1 %v4151_v3 }
 0x1ca   :  { %v322_v22 = vadd.f32 %v321_v21, %v218_v19  ;;  %v2536_v24 = vpop.f32.mrb[9].mxu1  ;;  %v3264_v19 = vrot.slane %v2335_v46, %v3191_v41  ;;  %v3267_v21 = vrot.slane %v2344_v42, %v3191_v41  ;;  %v3308_v42 = vsel %vm723_vm7, %v727_v53, %v3243_v7 }
 0x1cc   :  { %2558 = vmatmul.mubr.msk.f32.gmra.mrb[10].mxu0 %vm334_vm14, %v322_v22  ;;  %2331 = vmatmul.mubr.msk.f32.gmra.mrb[18].mxu1 %vm334_vm14, %v322_v22 }
 0x1cd   :  { %v326_v26 = vpop.f32.mrb[10].mxu1  ;;  %2560 = vmatprep.mubr.msk.f32.mxu0 %vm2937_vm0, %v4151_v3  ;;  %536 = vmatprep.mubr.f32.mxu1 %v4151_v3 }
 0x1ce   :  { %v327_v27 = vadd.f32 %v326_v26, %v219_v25  ;;  %v2539_v28 = vpop.f32.mrb[11].mxu1  ;;  %v3278_v26 = vsel %vm723_vm7, %v724_v14, %v3243_v7 }
 0x1cf   :  { %v3283_v28 = vsel %vm236_vm8, %v840_v20, %v3248_v10 }
 0x1d0   :  { %2561 = vmatmul.mubr.msk.f32.gmra.mrb[12].mxu0 %vm334_vm14, %v327_v27  ;;  %2332 = vmatmul.mubr.msk.f32.gmra.mrb[20].mxu1 %vm334_vm14, %v327_v27 }
 0x1d1   :  { %2573 = vmatprep.mubr.msk.f32.mxu0 %vm2937_vm0, %v4151_v3  ;;  %2590 = vmatprep.mubr.msk.f32.mxu1 %vm2937_vm0, %v4151_v3 }
 0x293   :  { %v3185_v38 = vpop.f32.mrb[4].mxu0  ;;  %v514_v39 = vpop.f32.mrb[12].mxu1 }
 0x294   :  { %4185 = vst [vmem:[#allocation6_spill] sm:$0xff] %v3185_v38  ;;  %v2550_v43 = vpop.f32.mrb[5].mxu0  ;;  %v3196_v44 = vpop.f32.mrb[13].mxu1  ;;  %v580_v8 = vrot.slane %v514_v39, 5  ;;  %v3272_v22 = vadd.f32 %v3238_v63, %v3185_v38  ;;  %v3300_v39 = vsel %vm723_vm7, %v3243_v7, %v727_v53 }
 0x295   :  { %v581_v45 = vrot.slane %v3196_v44, 5  ;;  %v3312_v43 = vsel %vm236_vm8, %v843_v54, %v3248_v10 }
 0x296   :  { %v608_v27 = vsel %vm579_vm3, 0.0, %v580_v8  ;;  %v1084_v46 = vand.u32 2147483647, %v3272_v22  ;;  %vm1074_vm15 = vcmp.ne.f32.partialorder %v3272_v22, %v3272_v22 }
 0x297   :  { %v3213_v51 = vpop.f32.mrb[6].mxu0  ;;  %v3215_v52 = vpop.f32.mrb[14].mxu1  ;;  %v609_v56 = vsel %vm579_vm3, 0.0, %v581_v45  ;;  %v810_v6 = vmul.f32 %v3258_v15, %v608_v27 }
 0x298   :  { %4187 = vst [vmem:[#allocation8_spill] sm:$0xff] %v3213_v51  ;;  %v2553_v57 = vpop.f32.mrb[7].mxu0  ;;  %v3225_v58 = vpop.f32.mrb[15].mxu1  ;;  %v636_v1 = vmul.f32 %v3205_v47, %v609_v56  ;;  %v694_v2 = vmul.f32 %v3207_v48, %v609_v56  ;;  %v811_v4 = vmul.f32 %v3209_v49, %v609_v56  ;;  %v3246_v9 = vmul.f32 %v3211_v50, %v609_v56 }
 0x299   :  { %v582_v25 = vrot.slane %v3215_v52, 5  ;;  %v584_v32 = vrot.slane %v3225_v58, 5  ;;  %v635_v52 = vmul.f32 %v3220_v55, %v608_v27  ;;  %v3318_v56 = vadd.f32 %v3238_v63, %v3213_v51 }
 0x29a   :  { %v661_v16 = vmul.f32 %v3228_v59, %v636_v1  ;;  %v693_v58 = vmul.f32 %v3255_v13, %v608_v27  ;;  %v739_v44 = vmul.f32 %v724_v14, %v694_v2  ;;  %v1089_v60 = vsub.f32 0.0, %v1084_v46 }
 0x29b   :  { %v3250_v11 = vpop.f32.mrb[8].mxu0  ;;  %v3252_v12 = vpop.f32.mrb[16].mxu1  ;;  %v3291_v35 = vsel %vm579_vm3, %v580_v8, %v582_v25  ;;  %v585_v57 = vsel %vm579_vm3, %v581_v45, %v584_v32  ;;  %v3333_v8 = vmul.f32 %v3267_v21, %v608_v27  ;;  %v950_v51 = vrot.slane %v3246_v9, 3 }
 0x29c   :  { %4188 = vst [vmem:[#allocation9_spill] sm:$0xff] %v3250_v11  ;;  %v2556_v17 = vpop.f32.mrb[9].mxu0  ;;  %v3261_v18 = vpop.f32.mrb[17].mxu1  ;;  %v671_v24 = vadd.f32 %v661_v16, %v3236_v62  ;;  %v638_v53 = vmul.f32 %v3205_v47, %v585_v57  ;;  %v696_v45 = vmul.f32 %v3207_v48, %v585_v57  ;;  %v813_v0 = vmul.f32 %v3209_v49, %v585_v57 }
 0x29d   :  { %v3343_v54 = vmul.f32 %v3211_v50, %v585_v57  ;;  %v1085_v27 = vand.u32 2147483647, %v3318_v56  ;;  %v4192_v57 = vrot.slane %v3261_v18, 5  ;;  %v660_v9 = vmul.f32 %v3228_v59, %v635_v52 }
 0x29e   :  { %v3339_v3 = vadd.f32 %v638_v53, %v3236_v62  ;;  %v3348_v2 = vmul.f32 %v3278_v26, %v696_v45  ;;  %v4191_v53 = vrot.slane %v3252_v12, 5  ;;  %v3363_v41 = vmul.f32 %v724_v14, %v693_v58 }
 0x29f   :  { %v3286_v33 = vpop.f32.mrb[10].mxu0  ;;  %v3288_v23 = vpop.f32.mrb[18].mxu1  ;;  %v589_v46 = vsel %vm579_vm3, %v584_v32, %v4192_v57  ;;  %v762_v45 = vrot.slane %v739_v44, 1  ;;  %v3375_v59 = vmul.f32 %v840_v20, %v810_v6  ;;  %v1090_v58 = vsub.f32 0.0, %v1085_v27 }
 0x2a0   :  { %4189 = vst [vmem:[#allocation10_spill] sm:$0xff] %v3286_v33  ;;  %v2559_v5 = vpop.f32.mrb[11].mxu0  ;;  %v3296_v37 = vpop.f32.mrb[19].mxu1  ;;  %v3357_v38 = vsel %vm579_vm3, %v582_v25, %v4191_v53  ;;  %v4166_v34 = vrot.slane %v3348_v2, 1  ;;  %v3372_v25 = vadd.f32 %v3238_v63, %v3250_v11  ;;  %v1094_v53 = vmul.f32 1.442695, %v1089_v60 }
 0x2a1   :  { %v855_v5 = vmul.f32 %v840_v20, %v811_v4  ;;  %v4164_v4 = vrot.slane %v3343_v54, 3  ;;  %v640_v20 = vmul.f32 %v3205_v47, %v589_v46  ;;  %v3391_v60 = vadd.f32 %v3238_v63, %v3286_v33 }
 0x2a2   :  { %v764_v14 = vsel %vm758_vm11, %v762_v45, %v4166_v34  ;;  %v695_v6 = vmul.f32 %v3255_v13, %v3291_v35  ;;  %v698_v45 = vmul.f32 %v3207_v48, %v589_v46  ;;  %2816 = vpow2.f32 %v1094_v53 }
 0x2a3   :  { %v3327_v61 = vpop.f32.mrb[12].mxu0  ;;  %v3329_v1 = vpop.f32.mrb[20].mxu1  ;;  %v952_v30 = vsel %vm946_vm10, %v950_v51, %v4164_v4  ;;  %v788_v44 = vadd.f32 %v764_v14, %v671_v24  ;;  %v1086_v24 = vand.u32 2147483647, %v3372_v25  ;;  %v815_v14 = vmul.f32 %v3209_v49, %v589_v46 }
 0x2a4   :  { %4190 = vst [vmem:[#allocation11_spill] sm:$0xff] %v3327_v61  ;;  %v2562_v16 = vpop.f32.mrb[13].mxu0  ;;  %v3336_v17 = vpop.f32.mrb[21].mxu1  ;;  %v1096_v4 = vmul.f32 1.442695, %v1090_v58  ;;  %v3403_v34 = vmul.f32 %v3300_v39, %v698_v45  ;;  %v3406_v32 = vmul.f32 %v3211_v50, %v589_v46  ;;  %v812_v58 = vmul.f32 %v3258_v15, %v3291_v35 }
 0x2a5   :  { %v3351_v16 = vmul.f32 %v3283_v28, %v813_v0  ;;  %v878_v0 = vrot.slane %v855_v5, 2  ;;  %v3385_v5 = vadd.f32 %v660_v9, %v3264_v19  ;;  %v3424_v46 = vmul.f32 %v3267_v21, %v3291_v35 }
 0x2a6   :  { %v590_v52 = vrot.slane %v3288_v23, 5  ;;  %v592_v9 = vrot.slane %v3296_v37, 5  ;;  %2818 = vpow2.f32 %v1096_v4  ;;  %v4194_v57 = vrot.slane %v3252_v12, 5 }
 0x2a7   :  { %v4165_v31 = vrot.slane %v3351_v16, 2  ;;  %v3448_v33 = vmul.f32 %v3283_v28, %v812_v58  ;;  %v3464_v28 = vmul.f32 %v3267_v21, %v3357_v38  ;;  %vm1075_vm1 = vcmp.ne.f32.partialorder %v3318_v56, %v3318_v56 }
 0x2a8   :  { %v591_v23 = vsel %vm579_vm3, %v4194_v57, %v590_v52  ;;  %vm1076_vm5 = vcmp.ne.f32.partialorder %v3372_v25, %v3372_v25  ;;  %vm1077_vm6 = vcmp.ne.f32.partialorder %v3391_v60, %v3391_v60 }
 0x2a9   :  { %v880_v51 = vsel %vm874_vm12, %v878_v0, %v4165_v31  ;;  %v665_v0 = vmul.f32 %v3294_v36, %v640_v20  ;;  %v1087_v20 = vand.u32 2147483647, %v3391_v60 }
 0x2aa   :  { %v904_v27 = vadd.f32 %v880_v51, %v788_v44  ;;  %v637_v44 = vmul.f32 %v3220_v55, %v3291_v35  ;;  %v3414_v51 = vmul.f32 %v3304_v40, %v815_v14  ;;  %v697_v14 = vmul.f32 %v3255_v13, %v3357_v38 }
 0x2ab   :  { %v3411_v53 = vadd.f32 %v665_v0, %v3236_v62  ;;  %v639_v0 = vmul.f32 %v3220_v55, %v3357_v38  ;;  %v3438_v35 = vadd.f32 %v3238_v63, %v3327_v61  ;;  %v1092_v45 = vsub.f32 0.0, %v1087_v20 }
 0x2ac   :  { %v3400_v31 = vadd.f32 %v952_v30, %v904_v27  ;;  %v3418_v30 = vmul.f32 %v3278_v26, %v695_v6  ;;  %v1091_v27 = vsub.f32 0.0, %v1086_v24  ;;  %v814_v6 = vmul.f32 %v3258_v15, %v3357_v38 }
 0x2ad   :  { %v3441_v24 = vadd.f32 %v637_v44, %v3264_v19  ;;  %v664_v63 = vmul.f32 %v3294_v36, %v639_v0  ;;  %v3453_v4 = vmul.f32 %v3300_v39, %v697_v14  ;;  %v4195_v44 = vrot.slane %v3261_v18, 5 }
 0x2ae   :  { %4193 = vst [vmem:[#allocation12_spill] sm:$0xff] %v3400_v31  ;;  %v1098_v11 = vmul.f32 1.442695, %v1091_v27  ;;  %v1088_v12 = vand.u32 2147483647, %v3438_v35  ;;  %v3460_v57 = vmul.f32 %v3304_v40, %v814_v6  ;;  %v594_v36 = vrot.slane %v3329_v1, 5  ;;  %v3468_v27 = vpop.eup %2816 }
 0x2af   :  { %v593_v20 = vsel %vm579_vm3, %v4195_v44, %v592_v9  ;;  %v1100_v39 = vmul.f32 1.442695, %v1092_v45  ;;  %v699_v40 = vmul.f32 %v3255_v13, %v591_v23  ;;  %v816_v6 = vmul.f32 %v3258_v15, %v591_v23 }
 0x2b0   :  { %v642_v58 = vmul.f32 %v3205_v47, %v593_v20  ;;  %v700_v18 = vmul.f32 %v3207_v48, %v593_v20  ;;  %v817_v0 = vmul.f32 %v3209_v49, %v593_v20  ;;  %v3473_v14 = vmul.f32 %v3211_v50, %v593_v20 }
 0x2b1   :  { %v1093_v44 = vsub.f32 0.0, %v1088_v12  ;;  %2820 = vpow2.f32 %v1098_v11  ;;  %v641_v20 = vmul.f32 %v3220_v55, %v591_v23  ;;  %v595_v61 = vsel %vm579_vm3, %v590_v52, %v594_v36 }
 0x2b2   :  { %v3478_v38 = vadd.f32 %v642_v58, %v3236_v62  ;;  %v3482_v45 = vmul.f32 %v3308_v42, %v700_v18  ;;  %v3485_v37 = vmul.f32 %v3312_v43, %v817_v0  ;;  %v596_v31 = vrot.slane %v3336_v17, 5  ;;  %v2819_v17 = vpop.eup %2818 }
 0x2b3   :  { %v1102_v26 = vmul.f32 1.442695, %v1093_v44  ;;  %v3491_v58 = vadd.f32 %v664_v63, %v3264_v19  ;;  %v765_v12 = vrot.slane %v3453_v4, 1  ;;  %2822 = vpow2.f32 %v1100_v39 }
 0x2b4   :  { %4196 = vst [vmem:[#allocation13_spill] sm:$0xff] %v3478_v38  ;;  %v3495_v11 = vmul.f32 %v3267_v21, %v591_v23  ;;  %v3500_v1 = vmul.f32 %v3308_v42, %v699_v40  ;;  %v3503_v52 = vmul.f32 %v3312_v43, %v816_v6  ;;  %v597_v23 = vsel %vm579_vm3, %v592_v9, %v596_v31 }
 0x2b5   :  { %v3511_v18 = vadd.f32 %v641_v20, %v3264_v19  ;;  %2824 = vpow2.f32 %v1102_v26  ;;  %v701_v42 = vmul.f32 %v3255_v13, %v595_v61  ;;  %v818_v40 = vmul.f32 %v3258_v15, %v595_v61 }
 0x2b6   :  { %v644_v6 = vmul.f32 %v3205_v47, %v597_v23  ;;  %v702_v36 = vmul.f32 %v3207_v48, %v597_v23  ;;  %v819_v9 = vmul.f32 %v3209_v49, %v597_v23  ;;  %v3522_v20 = vmul.f32 %v3211_v50, %v597_v23 }
 0x2b7   :  { %v1104_v15 = vadd.f32 1.0, %v3468_v27  ;;  %v1107_v47 = vmul.f32 -0.5, %v3468_v27  ;;  %v643_v48 = vmul.f32 %v3220_v55, %v595_v61  ;;  %v3532_v44 = vmul.f32 %v3243_v7, %v701_v42 }
 0x2b8   :  { %4197 = vst [vmem:[#allocation14_spill] sm:$0xff] %v3522_v20  ;;  %v679_v26 = vadd.f32 %v644_v6, %v3236_v62  ;;  %v3526_v13 = vmul.f32 %v3243_v7, %v702_v36  ;;  %v3535_v39 = vmul.f32 %v3267_v21, %v595_v61  ;;  %v1113_v49 = vadd.f32 1.0, %v2819_v17 }
 0x2b9   :  { %v3538_v23 = vmul.f32 %v3248_v10, %v818_v40  ;;  %2826 = vlog2.f32 %v1104_v15  ;;  %v1116_v36 = vmul.f32 -0.5, %v2819_v17  ;;  %v3549_v61 = vmul.f32 %v3248_v10, %v819_v9 }
 0x2ba   :  { %v4174_v62 = vrot.slane %v3526_v13, 1  ;;  %2828 = vlog2.f32 %v1113_v49  ;;  %v1108_v42 = vadd.f32 1.0, %v1107_v47  ;;  %v1110_v40 = vand.u32 2147483647, %v3468_v27 }
 0x2bb   :  { %v2821_v50 = vpop.eup %2820  ;;  %4199 = vst [vmem:[#allocation16_spill] sm:$0xff] %v3549_v61  ;;  %v3553_v15 = vadd.f32 %v643_v48, %v3264_v19  ;;  %v1117_v43 = vadd.f32 1.0, %v1116_v36  ;;  %v1119_v63 = vand.u32 2147483647, %v2819_v17  ;;  %v4224_v0 = vrot.slane %v3532_v44, 1 }
 0x2bc   :  { %v3546_v21 = vadd.f32 %v4174_v62, %v679_v26  ;;  %v1122_v31 = vadd.f32 1.0, %v2821_v50  ;;  %v1125_v26 = vmul.f32 -0.5, %v2821_v50  ;;  %v1128_v10 = vand.u32 2147483647, %v2821_v50 }
 0x2bd   :  { %v2823_v7 = vpop.eup %2822  ;;  %v1109_v48 = vmul.f32 %v3468_v27, %v1108_v42  ;;  %vm3561_vm13 = vcmp.lt.f32.partialorder %v1110_v40, 0.0004427343  ;;  %v1118_v6 = vmul.f32 %v2819_v17, %v1117_v43  ;;  %vm3569_vm2 = vcmp.lt.f32.partialorder %v1119_v63, 0.0004427343 }
 0x2be   :  { %4198 = vst [vmem:[#allocation15_spill] sm:$0xff] %v3546_v21  ;;  %2830 = vlog2.f32 %v1122_v31  ;;  %v1131_v9 = vadd.f32 1.0, %v2823_v7  ;;  %v1134_v47 = vmul.f32 -0.5, %v2823_v7  ;;  %v1126_v55 = vadd.f32 1.0, %v1125_v26 }
 0x2bf   :  { %v2825_v62 = vpop.eup %2824  ;;  %v1137_v31 = vand.u32 2147483647, %v2823_v7  ;;  %vm3573_vm3 = vcmp.lt.f32.partialorder %v1128_v10, 0.0004427343  ;;  %v4206_v43 = vrot.slane %v3418_v30, 1  ;;  %v4207_v26 = vrot.slane %v3363_v41, 1 }
 0x2c0   :  { %2832 = vlog2.f32 %v1131_v9  ;;  %v1135_v19 = vadd.f32 1.0, %v1134_v47  ;;  %v1140_v27 = vadd.f32 1.0, %v2825_v62  ;;  %v1143_v42 = vmul.f32 -0.5, %v2825_v62 }
 0x2c1   :  { %v1146_v17 = vand.u32 2147483647, %v2825_v62  ;;  %v761_v9 = vsel %vm758_vm11, %v4207_v26, %v4206_v43  ;;  %v4208_v63 = vmov %v4206_v43  ;;  %v1127_v61 = vmul.f32 %v2821_v50, %v1126_v55 }
 0x2c2   :  { %v766_v47 = vsel %vm758_vm11, %v4208_v63, %v765_v12  ;;  %2834 = vlog2.f32 %v1140_v27  ;;  %v1144_v10 = vadd.f32 1.0, %v1143_v42  ;;  %v787_v21 = vadd.f32 %v761_v9, %v3385_v5 }
 0x2c3   :  { %v2827_v29 = vpop.eup %2826  ;;  %v789_v49 = vadd.f32 %v766_v47, %v3441_v24  ;;  %vm3590_vm4 = vcmp.lt.f32.partialorder %v1137_v31, 0.0004427343  ;;  %v4211_v43 = vrot.slane %v3448_v33, 2  ;;  %v4212_v30 = vrot.slane %v3375_v59, 2 }
 0x2c4   :  { %v2829_v20 = vpop.eup %2828  ;;  %v1106_v38 = vmul.f32 0.6931472, %v2827_v29  ;;  %v4213_v27 = vrot.slane %v3460_v57, 2  ;;  %v1136_v29 = vmul.f32 %v2823_v7, %v1135_v19  ;;  %v4215_v59 = vrot.slane %v3424_v46, 3 }
 0x2c5   :  { %v877_v26 = vsel %vm874_vm12, %v4212_v30, %v4211_v43  ;;  %v4214_v42 = vmov %v4211_v43  ;;  %v1115_v24 = vmul.f32 0.6931472, %v2829_v20  ;;  %v4216_v9 = vrot.slane %v3333_v8, 3 }
 0x2c6   :  { %v882_v5 = vsel %vm874_vm12, %v4214_v42, %v4213_v27  ;;  %v903_v50 = vadd.f32 %v877_v26, %v787_v21  ;;  %v1112_v31 = vsel %vm3561_vm13, %v1109_v48, %v1106_v38  ;;  %v4217_v33 = vrot.slane %v3464_v28, 3  ;;  %v1166_v21 = vpop.permute.xlu1 %1165 }
 0x2c7   :  { %v905_v55 = vadd.f32 %v882_v5, %v789_v49  ;;  %v949_v63 = vsel %vm946_vm10, %v4216_v9, %v4215_v59  ;;  %v4218_v47 = vmov %v4215_v59  ;;  %v4219_v43 = vrot.slane %v3500_v1, 1 }
 0x2c8   :  { %v954_v20 = vsel %vm946_vm10, %v4218_v47, %v4217_v33  ;;  %v1121_v38 = vsel %vm3569_vm2, %v1118_v6, %v1115_v24  ;;  %v4220_v8 = vmax.f32 %v3272_v22, 0.0  ;;  %v1145_v19 = vmul.f32 %v2825_v62, %v1144_v10  ;;  %v2831_v4 = vpop.eup %2830 }
 0x2c9   :  { %v770_v7 = vsel %vm758_vm11, %v765_v12, %v4219_v43  ;;  %vm3629_vm7 = vcmp.lt.f32.partialorder %v1146_v17, 0.0004427343  ;;  %v3633_v48 = vadd.f32 %v949_v63, %v903_v50  ;;  %v4223_v12 = vmax.f32 %v3318_v56, 0.0 }
 0x2ca   :  { %v1149_v49 = vadd.f32 %v1112_v31, %v4220_v8  ;;  %v3637_v30 = vadd.f32 %v954_v20, %v905_v55  ;;  %v4225_v6 = vmov %v4219_v43  ;;  %v791_v62 = vadd.f32 %v770_v7, %v3491_v58  ;;  %v2833_v5 = vpop.eup %2832 }
 0x2cb   :  { %v1150_v36 = vadd.f32 %v1121_v38, %v4223_v12  ;;  %v774_v26 = vsel %vm758_vm11, %v4225_v6, %v4224_v0  ;;  %v1124_v10 = vmul.f32 0.6931472, %v2831_v4  ;;  %v2345_v27 = vmul.f32 -1.442695, %v3633_v48 }
 0x2cc   :  { %v3649_v17 = vsel %vm1074_vm15, %v3272_v22, %v1149_v49  ;;  %v793_v42 = vadd.f32 %v774_v26, %v3511_v18  ;;  %vm1078_vm9 = vcmp.ne.f32.partialorder %v3438_v35, %v3438_v35  ;;  %v2347_v22 = vmul.f32 -1.442695, %v3637_v30  ;;  %v2835_v20 = vpop.eup %2834 }
 0x2cd   :  { %v3657_v1 = vsel %vm1075_vm1, %v3318_v56, %v1150_v36  ;;  %v1168_v58 = vmul.f32 %v1166_v21, %v3649_v17  ;;  %v4226_v24 = vrot.slane %v3503_v52, 2  ;;  %v4227_v50 = vrot.slane %v3460_v57, 2 }
 0x2ce   :  { %v1169_v55 = vmul.f32 %v1166_v21, %v3657_v1  ;;  %v1130_v31 = vsel %vm3573_vm3, %v1127_v61, %v1124_v10  ;;  %v1133_v56 = vmul.f32 0.6931472, %v2833_v5  ;;  %2836 = vpow2.f32 %v2345_v27 }
 0x2cf   :  { %v886_v18 = vsel %vm874_vm12, %v4227_v50, %v4226_v24  ;;  %v4228_v59 = vmax.f32 %v3372_v25, 0.0  ;;  %2838 = vpow2.f32 %v2347_v22  ;;  %v4229_v63 = vrot.slane %v3538_v23, 2 }
 0x2d0   :  { %v4230_v33 = vmov %v4226_v24  ;;  %v907_v57 = vadd.f32 %v886_v18, %v791_v62  ;;  %v2796_v43 = vpack.i.bf16 %v1169_v55, %v1168_v58  ;;  %v1139_v7 = vsel %vm3590_vm4, %v1136_v29, %v1133_v56 }
 0x2d1   :  { %v1151_v9 = vadd.f32 %v1130_v31, %v4228_v59  ;;  %v890_v47 = vsel %vm874_vm12, %v4230_v33, %v4229_v63  ;;  %v4231_v61 = vrot.slane %v3495_v11, 3  ;;  %v4232_v38 = vrot.slane %v3464_v28, 3 }
 0x2d2   :  { %v909_v40 = vadd.f32 %v890_v47, %v793_v42  ;;  %v4233_v49 = vmax.f32 %v3391_v60, 0.0  ;;  %v1142_v12 = vmul.f32 0.6931472, %v2835_v20  ;;  %v4234_v41 = vrot.slane %v3535_v39, 3  ;;  %2797 = vrot.lane.b32.xlu0 %v2796_v43, %s2940_s12 }
 0x2d3   :  { %v958_v8 = vsel %vm946_vm10, %v4232_v38, %v4231_v61  ;;  %v3691_v52 = vsel %vm1076_vm5, %v3372_v25, %v1151_v9  ;;  %v4235_v29 = vmov %v4231_v61  ;;  %v4236_v26 = vrot.slane %v3532_v44, 1  ;;  %v4254_v61 = vld [vmem:[#allocation16_spill] sm:$0xff] }
 0x2d4   :  { %v1152_v4 = vadd.f32 %v1139_v7, %v4233_v49  ;;  %v962_v36 = vsel %vm946_vm10, %v4235_v29, %v4234_v41  ;;  %v1170_v28 = vmul.f32 %v1166_v21, %v3691_v52  ;;  %v3700_v0 = vadd.f32 %v958_v8, %v907_v57 }
 0x2d5   :  { %v3702_v6 = vadd.f32 %v962_v36, %v909_v40  ;;  %v795_v25 = vadd.f32 %v4236_v26, %v3553_v15  ;;  %v1148_v11 = vsel %vm3629_vm7, %v1145_v19, %v1142_v12  ;;  %v4237_v10 = vrot.slane %v3403_v34, 1 }
 0x2d6   :  { %v3711_v62 = vsel %vm1077_vm6, %v3391_v60, %v1152_v4  ;;  %v4238_v27 = vrot.slane %v3348_v2, 1  ;;  %v4239_v5 = vrot.slane %v3414_v51, 2  ;;  %v4240_v44 = vrot.slane %v3351_v16, 2 }
 0x2d7   :  { %v1171_v58 = vmul.f32 %v1166_v21, %v3711_v62  ;;  %v4241_v60 = vmax.f32 %v3438_v35, 0.0  ;;  %v2349_v46 = vmul.f32 -1.442695, %v3700_v0  ;;  %v2351_v19 = vmul.f32 -1.442695, %v3702_v6 }
 0x2d8   :  { %v768_v42 = vsel %vm758_vm11, %v4238_v27, %v4237_v10  ;;  %v884_v15 = vsel %vm874_vm12, %v4240_v44, %v4239_v5  ;;  %v4242_v24 = vmov %v4229_v63  ;;  %v4243_v18 = vrot.slane %v3406_v32, 3  ;;  %v2837_v57 = vpop.eup %2836 }
 0x2d9   :  { %v1153_v22 = vadd.f32 %v1148_v11, %v4241_v60  ;;  %v911_v2 = vadd.f32 %v4242_v24, %v795_v25  ;;  %v790_v50 = vadd.f32 %v768_v42, %v3339_v3  ;;  %v4244_v16 = vrot.slane %v3343_v54, 3  ;;  %v2839_v49 = vpop.eup %2838 }
 0x2da   :  { %v4245_v31 = vrot.slane %v3482_v45, 1  ;;  %v4246_v56 = vmov %v4237_v10  ;;  %v2801_v9 = vpack.i.bf16 %v1171_v58, %v1170_v28  ;;  %2840 = vpow2.f32 %v2349_v46  ;;  %v4258_v45 = vld [vmem:[#allocation14_spill] sm:$0xff] }
 0x2db   :  { %v956_v55 = vsel %vm946_vm10, %v4244_v16, %v4243_v18  ;;  %v1158_v23 = vsel %vm1078_vm9, %v3438_v35, %v1153_v22  ;;  %2842 = vpow2.f32 %v2351_v19  ;;  %v4247_v54 = vmov %v4234_v41 }
 0x2dc   :  { %v772_v59 = vsel %vm758_vm11, %v4246_v56, %v4245_v31  ;;  %v1172_v63 = vmul.f32 %v1166_v21, %v1158_v23  ;;  %v983_v33 = vadd.f32 %v4247_v54, %v911_v2  ;;  %v906_v47 = vadd.f32 %v884_v15, %v790_v50  ;;  %2802 = vrot.lane.b32.xlu1 %v2801_v9, %s2940_s12  ;;  %v4266_v54 = vld [vmem:[#allocation3_spill] sm:$0xff] }
 0x2dd   :  { %v792_v3 = vadd.f32 %v772_v59, %v3411_v53  ;;  %v4248_v34 = vrot.slane %v3485_v37, 2  ;;  %v4249_v20 = vmov %v4239_v5  ;;  %v4250_v35 = vrot.slane %v3473_v14, 3  ;;  %v4261_v37 = vld [vmem:[#allocation15_spill] sm:$0xff] }
 0x2de   :  { %v4251_v7 = vmov %v4243_v18  ;;  %v4252_v21 = vrot.slane %v3526_v13, 1  ;;  %v4253_v39 = vmov %v4245_v31  ;;  %v4255_v38 = vrot.slane %v4254_v61, 2  ;;  %1216 = vrot.lane.b32.xlu0 %v1172_v63, %s2940_s12  ;;  %v4257_v13 = vld [vmem:[#allocation13_spill] sm:$0xff]  ;;  %v4265_v63 = vld [vmem:[#allocation2_spill] sm:$0xff] }
 0x2df   :  { %v888_v43 = vsel %vm874_vm12, %v4249_v20, %v4248_v34  ;;  %v960_v53 = vsel %vm946_vm10, %v4251_v7, %v4250_v35  ;;  %v4256_v8 = vmov %v4248_v34  ;;  %v1015_v4 = vadd.f32 1.0, %v2837_v57  ;;  %v4267_v20 = vld [vmem:[#allocation4_spill] sm:$0xff] }
 0x2e0   :  { %v776_v40 = vsel %vm758_vm11, %v4253_v39, %v4252_v21  ;;  %v892_v51 = vsel %vm874_vm12, %v4256_v8, %v4255_v38  ;;  %v2353_v12 = vmul.f32 -1.442695, %v983_v33  ;;  %v3772_v32 = vadd.f32 %v956_v55, %v906_v47  ;;  %1359 = vrot.lane.b32.xlu1 %v3649_v17, %s2940_s12 }
 0x2e1   :  { %v908_v41 = vadd.f32 %v888_v43, %v792_v3  ;;  %v1017_v29 = vadd.f32 1.0, %v2839_v49  ;;  %v794_v36 = vadd.f32 %v776_v40, %v4257_v13  ;;  %v4259_v28 = vrot.slane %v4258_v45, 3  ;;  %v4269_v40 = vld [vmem:[#allocation5_spill] sm:$0xff] }
 0x2e2   :  { %v4260_v26 = vmov %v4250_v35  ;;  %v4262_v11 = vmov %v4255_v38  ;;  %2844 = vrcp.f32 %v1015_v4  ;;  %v4264_v3 = vmov 0.0|0.0  }
 0x2e3   :  { %v964_v25 = vsel %vm946_vm10, %v4260_v26, %v4259_v28  ;;  %v912_v10 = vadd.f32 %v4262_v11, %v4261_v37  ;;  %v3783_v27 = vadd.f32 %v960_v53, %v908_v41  ;;  %2846 = vrcp.f32 %v1017_v29 }
 0x2e4   :  { %v910_v42 = vadd.f32 %v892_v51, %v794_v36  ;;  %v4263_v5 = vmov %v4259_v28  ;;  %2848 = vpow2.f32 %v2353_v12  ;;  %v2841_v15 = vpop.eup %2840  ;;  %1361 = vrot.lane.b32.xlu1 %v3657_v1, %s2940_s12  ;;  %v1173_v47 = vsub.s32 %v4266_v54, %v4265_v63 }
 0x2e5   :  { %v3789_v44 = vadd.f32 %v4263_v5, %v912_v10  ;;  %v2843_v58 = vpop.eup %2842  ;;  %v1019_v60 = vadd.f32 1.0, %v2841_v15  ;;  %v1175_v43 = vsub.s32 %v4267_v20, %v4265_v63  ;;  %v547_v35 = vadd.s32 24, %v4266_v54 }
 0x2e6   :  { %v3791_v14 = vadd.f32 %v964_v25, %v910_v42  ;;  %v1021_v22 = vadd.f32 1.0, %v2843_v58  ;;  %vm1178_vm10 = vcmp.ge.s32.totalorder %v1173_v47, 0  ;;  %v4268_v7 = vmov 0.0  }
 0x2e7   :  { %2850 = vrcp.f32 %v1019_v60  ;;  %v3832_v53 = vsel %vm1178_vm10, 1.0, %v4268_v7  ;;  %vm1222_vm11 = vcmask 277504   ;;  %v548_v39 = vadd.s32 32, %v4266_v54 }
 0x2e8   :  { %2852 = vrcp.f32 %v1021_v22  ;;  %vm1180_vm13 = vcmp.ge.s32.totalorder %v1175_v43, 0  ;;  %vm1185_vm15 = vcmp.le.s32.totalorder %v1175_v43, %v4269_v40  ;;  %v2333_v61 = vadd.s32 4294967279, %v547_v35 }
 0x2e9   :  { %v1176_v38 = vsub.s32 %v547_v35, %v4265_v63  ;;  %vm1190_vm1 = vmand %vm1180_vm13, %vm1185_vm15  ;;  %v2334_v51 = vadd.s32 4294967279, %v548_v39  ;;  %v1177_v49 = vsub.s32 %v548_v39, %v4265_v63  ;;  %v1394_v29 = vmul.u32 16, %v4266_v54 }
 0x2ea   :  { %v3852_v4 = vsel %vm1190_vm1, 1.0, %v4268_v7  ;;  %v2350_v20 = vmul.f32 -1.442695, %v3783_v27  ;;  %vm1401_vm15 = vcmask 31744   ;;  %vm1631_vm1 = vcmask 523264  }
 0x2eb   :  { %vm1181_vm2 = vcmp.ge.s32.totalorder %v1176_v38, 0  ;;  %vm1186_vm3 = vcmp.le.s32.totalorder %v1176_v38, %v2333_v61  ;;  %vm1182_vm5 = vcmp.ge.s32.totalorder %v1177_v49, 0  ;;  %vm1187_vm6 = vcmp.le.s32.totalorder %v1177_v49, %v2334_v51 }
 0x2ec   :  { %v2845_v46 = vpop.eup %2844  ;;  %vm1191_vm4 = vmand %vm1181_vm2, %vm1186_vm3  ;;  %v1395_v13 = vsub.s32 %v4265_v63, %v1394_v29  ;;  %v2352_v51 = vmul.f32 -1.442695, %v3791_v14  ;;  %vm2291_vm3 = vcmask 130048  }
 0x2ed   :  { %v2847_v17 = vpop.eup %2846  ;;  %v3796_v24 = vmul.f32 %v2845_v46, %v3633_v48  ;;  %v3859_v12 = vsel %vm1191_vm4, 1.0, %v4268_v7  ;;  %vm1192_vm7 = vmand %vm1182_vm5, %vm1187_vm6  ;;  %v4270_v46 = vld [vmem:[#allocation7_spill] sm:$0xff] }
 0x2ee   :  { %v2849_v19 = vpop.eup %2848  ;;  %v3799_v2 = vmul.f32 %v2847_v17, %v3637_v30  ;;  %v3866_v41 = vsel %vm1192_vm7, 1.0, %v4268_v7  ;;  %vm1396_vm9 = vcmp.ge.s32.totalorder %v1395_v13, 0  ;;  %vm1397_vm10 = vcmp.lt.s32.totalorder %v1395_v13, 16  ;;  %vm3887_vm2 = vmpackc.low %vm1631_vm1, %vm1631_vm1 }
 0x2ef   :  { %v1023_v50 = vadd.f32 1.0, %v2849_v19  ;;  %vm1398_vm13 = vmand %vm1396_vm9, %vm1397_vm10 }
 0x2f0   :  { %v2806_v18 = vpack.i.bf16 %v3799_v2, %v3796_v24  ;;  %v2368_v36 = vsel %vm1398_vm13, 1.0, %v4268_v7 }
 0x2f1   :  { %2854 = vrcp.f32 %v1023_v50  ;;  %v2851_v1 = vpop.eup %2850 }
 0x2f2   :  { %2807 = vrot.lane.b32.xlu0 %v2806_v18, %s2940_s12  ;;  %v2853_v16 = vpop.eup %2852  ;;  %v3807_v55 = vmul.f32 %v2851_v1, %v3700_v0 }
 0x2f3   :  { %v3810_v48 = vmul.f32 %v2853_v16, %v3702_v6 }
 0x2f5   :  { %v2811_v30 = vpack.i.bf16 %v3810_v48, %v3807_v55 }
 0x2f6   :  { %1363 = vrot.lane.b32.xlu0 %v3691_v52, %s2940_s12 }
 0x2f7   :  { %2812 = vrot.lane.b32.xlu1 %v2811_v30, %s2940_s12 }
 0x2fa   :  { %1365 = vrot.lane.b32.xlu0 %v3711_v62, %s2940_s12  ;;  %v545_v62 = vadd.s32 8, %v4266_v54 }
 0x2fb   :  { %v2855_v31 = vpop.eup %2854  ;;  %1367 = vrot.lane.b32.xlu1 %v1158_v23, %s2940_s12 }
 0x2fc   :  { %v3817_v56 = vmul.f32 %v2855_v31, %v983_v33  ;;  %v1174_v23 = vsub.s32 %v545_v62, %v4265_v63 }
 0x2fe   :  { %1629 = vrot.lane.b32.xlu0 %v3817_v56, %s2940_s12  ;;  %vm1179_vm12 = vcmp.ge.s32.totalorder %v1174_v23, 0 }
 0x2ff   :  { %v3844_v8 = vsel %vm1179_vm12, 1.0, %v4268_v7  ;;  %vm1417_vm12 = vcmask 1043456  }
 0x300   :  { %2589 = vmatpush3.msk.msra.mxu1 %vm1417_vm12, %v2368_v36 }
 0x301   :  { %2752 = vmatprep.subr.bf16.mxu1 %v4264_v3 }
 0x344   :  { %v2798_v52 = vpop.permute.xlu0 %2797 }
 0x345   :  { %v2800_v0 = vunpack.i.h.bf16 %v2798_v52  ;;  %v2799_v6 = vunpack.i.l.bf16 %v2798_v52 }
 0x347   :  { %v2747_v59 = vpack.c.bf16 %v2800_v0, %v2799_v6  ;;  %v4271_v0 = vld [vmem:[#allocation12_spill] sm:$0xff] }
 0x348   :  { %v2346_v6 = vmul.f32 -1.442695, %v4271_v0 }
 0x349   :  { %2748 = vmatpush3.bf16.msra.mxu0 %v2747_v59 }
 0x34a   :  { %2749 = vmatprep.subr.bf16.mxu0 %v4264_v3 }
 0x34e   :  { %v2803_v9 = vpop.permute.xlu1 %2802 }
 0x34f   :  { %v2805_v33 = vunpack.i.h.bf16 %v2803_v9  ;;  %v2804_v57 = vunpack.i.l.bf16 %v2803_v9 }
 0x350   :  { %v1217_v21 = vpop.permute.xlu0 %1216 }
 0x351   :  { %v2750_v34 = vpack.c.bf16 %v2805_v33, %v2804_v57  ;;  %v2348_v33 = vmul.f32 -1.442695, %v3772_v32 }
 0x352   :  { %v1360_v57 = vpop.permute.xlu1 %1359 }
 0x353   :  { %2751 = vmatpush3.bf16.msra.mxu0 %v2750_v34 }
 0x354   :  { %2571 = vmatprep.subr.mxu0 %v4268_v7 }
 0x356   :  { %v1362_v39 = vpop.permute.xlu1 %1361 }
 0x357   :  { %2572 = vmatpush3.msk.msra.mxu0 %vm236_vm8, %v1217_v21 }
 0x358   :  { %2574 = vmatmul.mubr.msk.f32.vlgmr.msra.gmra.mrb[14].mxu0 %vm1222_vm11, %v3832_v53  ;;  %2605 = vmatprep.subr.mxu0 %v4268_v7 }
 0x359   :  { %2576 = vmatprep.mubr.msk.f32.mxu0 %vm2937_vm0, %v4268_v7  ;;  %2606 = vmatpush3.msk.msra.mxu0 %vm1417_vm12, %v2368_v36 }
 0x35a   :  { %2760 = vmatprep.subr.bf16.mxu0 %v4264_v3 }
 0x35c   :  { %2577 = vmatmul.mubr.msk.f32.gmra.mrb[16].mxu0 %vm1222_vm11, %v3844_v8 }
 0x35d   :  { %2579 = vmatprep.mubr.msk.f32.mxu0 %vm2937_vm0, %v4268_v7 }
 0x360   :  { %2580 = vmatmul.mubr.msk.f32.gmra.mrb[18].mxu0 %vm1222_vm11, %v3852_v4 }
 0x361   :  { %2582 = vmatprep.mubr.msk.f32.mxu0 %vm2937_vm0, %v4268_v7 }
 0x364   :  { %2583 = vmatmul.mubr.msk.f32.gmra.mrb[20].mxu0 %vm1222_vm11, %v3859_v12  ;;  %v2808_v43 = vpop.permute.xlu0 %2807 }
 0x365   :  { %2585 = vmatprep.mubr.msk.f32.mxu0 %vm2937_vm0, %v4268_v7  ;;  %v2810_v61 = vunpack.i.h.bf16 %v2808_v43  ;;  %v2809_v38 = vunpack.i.l.bf16 %v2808_v43 }
 0x368   :  { %2586 = vmatmul.mubr.msk.f32.gmra.mrb[22].mxu0 %vm1222_vm11, %v3866_v41 }
 0x369   :  { %2607 = vmatprep.mubr.msk.f32.mxu0 %vm2937_vm0, %v4268_v7 }
 0x42b   :  { %v1306_v45 = vpop.f32.mrb[14].mxu0 }
 0x42c   :  { %v2575_v28 = vpop.f32.mrb[15].mxu0 }
 0x42f   :  { %v1311_v26 = vpop.f32.mrb[16].mxu0 }
 0x430   :  { %v2578_v25 = vpop.f32.mrb[17].mxu0 }
 0x433   :  { %v1316_v37 = vpop.f32.mrb[18].mxu0 }
 0x434   :  { %v2581_v11 = vpop.f32.mrb[19].mxu0 }
 0x435   :  { %v2813_v11 = vpop.permute.xlu1 %2812 }
 0x437   :  { %v1321_v10 = vpop.f32.mrb[20].mxu0 }
 0x438   :  { %v2584_v42 = vpop.f32.mrb[21].mxu0 }
 0x43b   :  { %v1326_v5 = vpop.f32.mrb[22].mxu0 }
 0x43c   :  { %v1331_v15 = vrot.slane %v1326_v5, 1  ;;  %v2587_v58 = vpop.f32.mrb[23].mxu0 }
 0x43e   :  { %v1333_v60 = vmin.f32 %v1316_v37, %v1331_v15 }
 0x440   :  { %v1334_v22 = vmul.f32 0.5, %v1333_v60 }
 0x442   :  { %v1338_v17 = vrot.slane %v1334_v22, %v4270_v46  ;;  %v1364_v22 = vpop.permute.xlu0 %1363  ;;  %v2815_v46 = vunpack.i.h.bf16 %v2813_v11 }
 0x444   :  { %v1343_v19 = vsub.f32 %v1338_v17, %v1326_v5  ;;  %v1379_v50 = vsub.f32 %v1306_v45, %v1338_v17  ;;  %v1383_v18 = vsub.f32 %v1326_v5, %v1338_v17  ;;  %v1339_v1 = vsub.f32 %v1338_v17, %v1306_v45 }
 0x445   :  { %v1380_v16 = vsub.f32 %v1311_v26, %v1338_v17  ;;  %v1340_v30 = vsub.f32 %v1338_v17, %v1311_v26  ;;  %v1381_v31 = vsub.f32 %v1316_v37, %v1338_v17  ;;  %v1341_v52 = vsub.f32 %v1338_v17, %v1316_v37 }
 0x446   :  { %v1384_v59 = vmul.f32 1.442695, %v1379_v50  ;;  %v1382_v9 = vsub.f32 %v1321_v10, %v1338_v17  ;;  %v1344_v63 = vmul.f32 1.442695, %v1339_v1  ;;  %v1342_v54 = vsub.f32 %v1338_v17, %v1321_v10 }
 0x447   :  { %v1386_v47 = vmul.f32 1.442695, %v1380_v16  ;;  %v1346_v62 = vmul.f32 1.442695, %v1340_v30  ;;  %v1388_v34 = vmul.f32 1.442695, %v1381_v31  ;;  %v2753_v37 = vpack.c.bf16 %v2810_v61, %v2809_v38 }
 0x448   :  { %2856 = vpow2.f32 %v1384_v59  ;;  %v1348_v23 = vmul.f32 1.442695, %v1341_v52  ;;  %v1390_v35 = vmul.f32 1.442695, %v1382_v9  ;;  %v1350_v21 = vmul.f32 1.442695, %v1342_v54  ;;  %v1366_v52 = vpop.permute.xlu0 %1365  ;;  %v1368_v54 = vpop.permute.xlu1 %1367 }
 0x449   :  { %2858 = vpow2.f32 %v2346_v6  ;;  %v1352_v29 = vmul.f32 1.442695, %v1343_v19  ;;  %v1392_v36 = vmul.f32 1.442695, %v1383_v18  ;;  %v2354_v10 = vmul.f32 -1.442695, %v3789_v44 }
 0x44a   :  { %2860 = vpow2.f32 %v1344_v63  ;;  %v2814_v17 = vunpack.i.l.bf16 %v2813_v11 }
 0x44b   :  { %2862 = vpow2.f32 %v1386_v47 }
 0x44c   :  { %2864 = vpow2.f32 %v1346_v62  ;;  %v2757_v30 = vpack.c.bf16 %v2815_v46, %v2814_v17 }
 0x44d   :  { %2866 = vpow2.f32 %v2348_v33 }
 0x44e   :  { %2868 = vpow2.f32 %v1388_v34  ;;  %v1630_v34 = vpop.permute.xlu0 %1629 }
 0x44f   :  { %2870 = vpow2.f32 %v1348_v23 }
 0x450   :  { %2872 = vpow2.f32 %v2350_v20 }
 0x451   :  { %2874 = vpow2.f32 %v1390_v35 }
 0x452   :  { %v2857_v40 = vpop.eup %2856  ;;  %2876 = vpow2.f32 %v1350_v21 }
 0x453   :  { %v2859_v49 = vpop.eup %2858  ;;  %2608 = vmatmul.mubr.msk.f32.vlgmr.msra.gmra.mrb[24].mxu0 %vm1401_vm15, %v2857_v40  ;;  %2878 = vpow2.f32 %v2352_v51 }
 0x454   :  { %v2861_v13 = vpop.eup %2860  ;;  %2610 = vmatprep.mubr.msk.f32.mxu0 %vm2937_vm0, %v4268_v7  ;;  %2880 = vpow2.f32 %v1352_v29  ;;  %v1016_v5 = vadd.f32 1.0, %v2859_v49 }
 0x455   :  { %v2863_v45 = vpop.eup %2862  ;;  %v1374_v28 = vmul.f32 %v2861_v13, %v1360_v57  ;;  %2882 = vpow2.f32 %v1392_v36 }
 0x456   :  { %v2865_v25 = vpop.eup %2864  ;;  %2884 = vpow2.f32 %v2354_v10 }
 0x457   :  { %2591 = vmatmul.mubr.msk.f32.vlgmr.msra.gmra.mrb[22].mxu1 %vm1401_vm15, %v1374_v28  ;;  %2611 = vmatmul.mubr.msk.f32.gmra.mrb[26].mxu0 %vm1401_vm15, %v2863_v45  ;;  %v2867_v42 = vpop.eup %2866  ;;  %v1375_v58 = vmul.f32 %v2865_v25, %v1362_v39  ;;  %2886 = vrcp.f32 %v1016_v5 }
 0x458   :  { %2755 = vmatpush3.bf16.xpose.msk.msra.mxu1 %vm3887_vm2, %v2753_v37  ;;  %2593 = vmatprep.mubr.msk.f32.mxu1 %vm2937_vm0, %v4268_v7  ;;  %v2869_v15 = vpop.eup %2868  ;;  %v1018_v50 = vadd.f32 1.0, %v2867_v42 }
 0x459   :  { %2613 = vmatprep.mubr.msk.f32.mxu0 %vm2937_vm0, %v4268_v7  ;;  %2756 = vmatprep.subr.bf16.mxu1 %v4264_v3  ;;  %v2871_v60 = vpop.eup %2870 }
 0x45a   :  { %v2873_v19 = vpop.eup %2872  ;;  %v1376_v1 = vmul.f32 %v2871_v60, %v1364_v22  ;;  %2888 = vrcp.f32 %v1018_v50 }
 0x45b   :  { %2594 = vmatmul.mubr.msk.f32.gmra.mrb[24].mxu1 %vm1401_vm15, %v1375_v58  ;;  %2614 = vmatmul.mubr.msk.f32.gmra.mrb[28].mxu0 %vm1401_vm15, %v2869_v15  ;;  %v2875_v18 = vpop.eup %2874  ;;  %v1020_v6 = vadd.f32 1.0, %v2873_v19 }
 0x45c   :  { %2596 = vmatprep.mubr.msk.f32.mxu1 %vm2937_vm0, %v4268_v7  ;;  %2616 = vmatprep.mubr.msk.f32.mxu0 %vm2937_vm0, %v4268_v7  ;;  %v2877_v16 = vpop.eup %2876 }
 0x45d   :  { %v2879_v31 = vpop.eup %2878  ;;  %v1377_v9 = vmul.f32 %v2877_v16, %v1366_v52  ;;  %2890 = vrcp.f32 %v1020_v6 }
 0x45e   :  { %v2881_v59 = vpop.eup %2880  ;;  %v1022_v47 = vadd.f32 1.0, %v2879_v31 }
 0x45f   :  { %2597 = vmatmul.mubr.msk.f32.gmra.mrb[26].mxu1 %vm1401_vm15, %v1376_v1  ;;  %2617 = vmatmul.mubr.msk.f32.gmra.mrb[30].mxu0 %vm1401_vm15, %v2875_v18  ;;  %v2883_v63 = vpop.eup %2882  ;;  %v1378_v33 = vmul.f32 %v2881_v59, %v1368_v54 }
 0x460   :  { %2759 = vmatpush3.bf16.xpose.msk.msra.mxu1 %vm3887_vm2, %v2757_v30  ;;  %2599 = vmatprep.mubr.msk.f32.mxu1 %vm2937_vm0, %v4268_v7  ;;  %v2885_v62 = vpop.eup %2884  ;;  %2892 = vrcp.f32 %v1022_v47 }
 0x461   :  { %2619 = vmatprep.mubr.msk.f32.mxu0 %vm2937_vm0, %v4268_v7  ;;  %2630 = vmatprep.subr.mxu1 %v4268_v7  ;;  %v2887_v57 = vpop.eup %2886  ;;  %v1024_v23 = vadd.f32 1.0, %v2885_v62 }
 0x462   :  { %v1046_v20 = vmul.f32 %v2887_v57, %v4271_v0 }
 0x463   :  { %2600 = vmatmul.mubr.msk.f32.gmra.mrb[28].mxu1 %vm1401_vm15, %v1377_v9  ;;  %2620 = vmatmul.mubr.msk.f32.gmra.mrb[32].mxu0 %vm1401_vm15, %v2883_v63  ;;  %2894 = vrcp.f32 %v1024_v23  ;;  %v4276_v23 = vld [vmem:[#allocation9_spill] sm:$0xff] }
 0x464   :  { %2602 = vmatprep.mubr.msk.f32.mxu1 %vm2937_vm0, %v4268_v7  ;;  %2657 = vmatprep.mubr.msk.f32.mxu0 %vm2937_vm0, %v4268_v7  ;;  %v2889_v43 = vpop.eup %2888 }
 0x465   :  { %v1048_v35 = vmul.f32 %v2889_v43, %v3772_v32  ;;  %v4277_v43 = vld [vmem:[#allocation10_spill] sm:$0xff] }
 0x467   :  { %2603 = vmatmul.mubr.msk.f32.gmra.mrb[30].mxu1 %vm1401_vm15, %v1378_v33  ;;  %v2891_v21 = vpop.eup %2890 }
 0x468   :  { %2631 = vmatpush3.xpose.msk.msra.mxu1 %vm1631_vm1, %v1630_v34  ;;  %2632 = vmatprep.mubr.msk.f32.mxu1 %vm2937_vm0, %v4268_v7  ;;  %v1050_v39 = vmul.f32 %v2891_v21, %v3783_v27  ;;  %v4275_v34 = vld [vmem:[#allocation8_spill] sm:$0xff] }
 0x469   :  { %2766 = vmatprep.subr.bf16.mxu1 %v4264_v3 }
 0x46a   :  { %v2893_v0 = vpop.eup %2892 }
 0x46b   :  { %2633 = vmatmul.mubr.msk.f32.vlgmr.msra.gmra.mrb[32].mxu1 %vm1631_vm1, %v1046_v20  ;;  %v1052_v40 = vmul.f32 %v2893_v0, %v3791_v14  ;;  %v2400_v20 = vmul.f32 -1.442695, %v4276_v23 }
 0x46c   :  { %2635 = vmatprep.mubr.msk.f32.mxu1 %vm2937_vm0, %v4268_v7 }
 0x46d   :  { %v2895_v61 = vpop.eup %2894 }
 0x46e   :  { %v1054_v32 = vmul.f32 %v2895_v61, %v3789_v44 }
 0x46f   :  { %2636 = vmatmul.mubr.msk.f32.gmra.mrb[34].mxu1 %vm1631_vm1, %v1048_v35  ;;  %v2401_v35 = vmul.f32 -1.442695, %v4277_v43 }
 0x470   :  { %2638 = vmatprep.mubr.msk.f32.mxu1 %vm2937_vm0, %v4268_v7 }
 0x473   :  { %2639 = vmatmul.mubr.msk.f32.gmra.mrb[36].mxu1 %vm1631_vm1, %v1050_v39 }
 0x474   :  { %2641 = vmatprep.mubr.msk.f32.mxu1 %vm2937_vm0, %v4268_v7 }
 0x477   :  { %2642 = vmatmul.mubr.msk.f32.gmra.mrb[38].mxu1 %vm1631_vm1, %v1052_v40 }
 0x478   :  { %2644 = vmatprep.mubr.msk.f32.mxu1 %vm2937_vm0, %v4268_v7 }
 0x47b   :  { %2645 = vmatmul.mubr.msk.f32.gmra.mrb[40].mxu1 %vm1631_vm1, %v1054_v32 }
 0x47c   :  { %2688 = vmatprep.mubr.msk.f32.mxu1 %vm2937_vm0, %v4268_v7 }
 0x526   :  { %v3947_v27 = vpop.f32.mrb[24].mxu0 }
 0x527   :  { %v2609_v38 = vpop.f32.mrb[25].mxu0 }
 0x52a   :  { %v1487_v51 = vpop.f32.mrb[22].mxu1  ;;  %v3949_v49 = vpop.f32.mrb[26].mxu0 }
 0x52b   :  { %v2592_v14 = vpop.f32.mrb[23].mxu1  ;;  %v2612_v29 = vpop.f32.mrb[27].mxu0  ;;  %v1752_v45 = vmul.f32 %v1487_v51, %v3796_v24 }
 0x52c   :  { %v2397_v29 = vld [vmem:[%s4145_s8 + $0x4] ss:$0 sm:$0xff] }
 0x52e   :  { %v1492_v13 = vpop.f32.mrb[24].mxu1  ;;  %v3951_v36 = vpop.f32.mrb[28].mxu0 }
 0x52f   :  { %v1753_v44 = vmul.f32 %v1492_v13, %v3799_v2  ;;  %v2595_v28 = vpop.f32.mrb[25].mxu1  ;;  %v2615_v26 = vpop.f32.mrb[29].mxu0 }
 0x530   :  { %v1875_v26 = vmul.f32 %v2397_v29, %v3796_v24 }
 0x531   :  { %v2761_v25 = vpack.c.bf16 %v1753_v44, %v1752_v45 }
 0x532   :  { %v1497_v37 = vpop.f32.mrb[26].mxu1  ;;  %v3955_v11 = vpop.f32.mrb[30].mxu0 }
 0x533   :  { %v2598_v10 = vpop.f32.mrb[27].mxu1  ;;  %2762 = vmatpush3.bf16.msra.mxu0 %v2761_v25  ;;  %v2618_v42 = vpop.f32.mrb[31].mxu0  ;;  %v1754_v58 = vmul.f32 %v1497_v37, %v3807_v55 }
 0x534   :  { %2763 = vmatprep.subr.bf16.mxu0 %v4264_v3 }
 0x536   :  { %v1502_v5 = vpop.f32.mrb[28].mxu1  ;;  %v3958_v15 = vpop.f32.mrb[32].mxu0 }
 0x537   :  { %v1755_v60 = vmul.f32 %v1502_v5, %v3810_v48  ;;  %v2601_v22 = vpop.f32.mrb[29].mxu1  ;;  %v2621_v46 = vpop.f32.mrb[33].mxu0 }
 0x538   :  { %v1876_v22 = vmul.f32 %v2397_v29, %v3799_v2 }
 0x539   :  { %v2764_v17 = vpack.c.bf16 %v1755_v60, %v1754_v58 }
 0x53a   :  { %v1507_v19 = vpop.f32.mrb[30].mxu1 }
 0x53b   :  { %v2604_v50 = vpop.f32.mrb[31].mxu1  ;;  %2765 = vmatpush3.bf16.msra.mxu0 %v2764_v17  ;;  %v1756_v18 = vmul.f32 %v1507_v19, %v3817_v56 }
 0x53c   :  { %2655 = vmatprep.subr.mxu0 %v4268_v7 }
 0x53e   :  { %v1723_v1 = vpop.f32.mrb[32].mxu1 }
 0x53f   :  { %v1747_v16 = vmul.f32 %v3832_v53, %v1723_v1  ;;  %v2634_v30 = vpop.f32.mrb[33].mxu1  ;;  %2656 = vmatpush3.msk.msra.mxu0 %vm236_vm8, %v1756_v18  ;;  %vm1942_vm8 = vcmask 517120  }
 0x540   :  { %2778 = vmatprep.subr.bf16.mxu0 %v4264_v3 }
 0x541   :  { %2658 = vmatmul.mubr.msk.f32.vlgmr.msra.gmra.mrb[34].mxu0 %vm1222_vm11, %v1747_v16  ;;  %v1877_v16 = vmul.f32 %v2397_v29, %v3807_v55 }
 0x542   :  { %v1728_v31 = vpop.f32.mrb[34].mxu1  ;;  %2660 = vmatprep.mubr.msk.f32.mxu0 %vm2937_vm0, %v4268_v7 }
 0x543   :  { %v1748_v52 = vmul.f32 %v3844_v8, %v1728_v31  ;;  %v2637_v6 = vpop.f32.mrb[35].mxu1 }
 0x545   :  { %2661 = vmatmul.mubr.msk.f32.gmra.mrb[36].mxu0 %vm1222_vm11, %v1748_v52 }
 0x546   :  { %v1733_v59 = vpop.f32.mrb[36].mxu1  ;;  %2663 = vmatprep.mubr.msk.f32.mxu0 %vm2937_vm0, %v4268_v7 }
 0x547   :  { %v1749_v53 = vmul.f32 %v3852_v4, %v1733_v59  ;;  %v2640_v9 = vpop.f32.mrb[37].mxu1  ;;  %v4274_v4 = vld [vmem:[#allocation6_spill] sm:$0xff] }
 0x548   :  { %v2398_v57 = vmul.f32 -1.442695, %v4274_v4 }
 0x549   :  { %2664 = vmatmul.mubr.msk.f32.gmra.mrb[38].mxu0 %vm1222_vm11, %v1749_v53 }
 0x54a   :  { %v1738_v63 = vpop.f32.mrb[38].mxu1  ;;  %2666 = vmatprep.mubr.msk.f32.mxu0 %vm2937_vm0, %v4268_v7  ;;  %2896 = vpow2.f32 %v2398_v57 }
 0x54b   :  { %v1750_v54 = vmul.f32 %v3859_v12, %v1738_v63  ;;  %v2643_v47 = vpop.f32.mrb[39].mxu1  ;;  %v2399_v12 = vmul.f32 -1.442695, %v4275_v34 }
 0x54d   :  { %2667 = vmatmul.mubr.msk.f32.gmra.mrb[40].mxu0 %vm1222_vm11, %v1750_v54  ;;  %2898 = vpow2.f32 %v2399_v12 }
 0x54e   :  { %v1743_v8 = vpop.f32.mrb[40].mxu1  ;;  %2669 = vmatprep.mubr.msk.f32.mxu0 %vm2937_vm0, %v4268_v7  ;;  %2900 = vpow2.f32 %v2400_v20 }
 0x54f   :  { %v1751_v62 = vmul.f32 %v3866_v41, %v1743_v8  ;;  %v2646_v33 = vpop.f32.mrb[41].mxu1  ;;  %2902 = vpow2.f32 %v2401_v35  ;;  %v4278_v41 = vld [vmem:[#allocation11_spill] sm:$0xff] }
 0x550   :  { %v2402_v39 = vmul.f32 -1.442695, %v4278_v41 }
 0x551   :  { %2670 = vmatmul.mubr.msk.f32.gmra.mrb[42].mxu0 %vm1222_vm11, %v1751_v62  ;;  %vm2102_vm11 = vcmask 254976  }
 0x552   :  { %2711 = vmatprep.mubr.msk.f32.mxu0 %vm2937_vm0, %v4268_v7  ;;  %2904 = vpow2.f32 %v2402_v39  ;;  %v1977_v39 = vld [vmem:[%s4148_s6] sm:$0xff] }
 0x554   :  { %v2897_v21 = vpop.eup %2896 }
 0x555   :  { %v1900_v0 = vadd.f32 1.0, %v2897_v21 }
 0x557   :  { %v2899_v40 = vpop.eup %2898  ;;  %2906 = vrcp.f32 %v1900_v0  ;;  %v1979_v0 = vld [vmem:[%s4148_s6 + $0x10] sm:$0xff] }
 0x558   :  { %v1901_v61 = vadd.f32 1.0, %v2899_v40  ;;  %v2901_v32 = vpop.eup %2900 }
 0x559   :  { %v1902_v38 = vadd.f32 1.0, %v2901_v32  ;;  %v2903_v51 = vpop.eup %2902 }
 0x55a   :  { %2908 = vrcp.f32 %v1901_v61  ;;  %v1903_v14 = vadd.f32 1.0, %v2903_v51  ;;  %v1980_v61 = vld [vmem:[%s4148_s6 + $0x18] sm:$0xff]  ;;  %v1982_v51 = vld [vmem:[%s4148_s6 + $0x28] sm:$0xff] }
 0x55b   :  { %2910 = vrcp.f32 %v1902_v38  ;;  %v2770_v32 = vpack.c.bf16 %v1980_v61, %v1979_v0  ;;  %v1981_v38 = vld [vmem:[%s4148_s6 + $0x20] sm:$0xff] }
 0x55c   :  { %v2905_v13 = vpop.eup %2904  ;;  %2912 = vrcp.f32 %v1903_v14  ;;  %v2773_v14 = vpack.c.bf16 %v1982_v51, %v1981_v38 }
 0x55d   :  { %v1904_v37 = vadd.f32 1.0, %v2905_v13  ;;  %v1984_v13 = vld [vmem:[%s4148_s6 + $0x38] sm:$0xff] }
 0x55f   :  { %2914 = vrcp.f32 %v1904_v37 }
 0x561   :  { %v2907_v45 = vpop.eup %2906 }
 0x562   :  { %v1915_v10 = vmul.f32 %v2907_v45, %v4274_v4 }
 0x564   :  { %v2909_v5 = vpop.eup %2908 }
 0x565   :  { %v2911_v50 = vpop.eup %2910 }
 0x566   :  { %v1917_v31 = vmul.f32 %v2911_v50, %v4276_v23  ;;  %v2913_v59 = vpop.eup %2912 }
 0x567   :  { %v1918_v47 = vmul.f32 %v2913_v59, %v4277_v43 }
 0x569   :  { %v2915_v33 = vpop.eup %2914 }
 0x56a   :  { %v1919_v23 = vmul.f32 %v2915_v33, %v4278_v41  ;;  %v1978_v41 = vld [vmem:[%s4148_s6 + $0x8] sm:$0xff] }
 0x56b   :  { %v2767_v40 = vpack.c.bf16 %v1978_v41, %v1977_v39 }
 0x56d   :  { %2768 = vmatpush3.bf16.msra.mxu1 %v2767_v40 }
 0x56e   :  { %2769 = vmatprep.subr.bf16.mxu1 %v4264_v3 }
 0x571   :  { %2771 = vmatpush3.bf16.msra.mxu1 %v2770_v32 }
 0x572   :  { %2772 = vmatprep.subr.bf16.mxu1 %v4264_v3 }
 0x575   :  { %2774 = vmatpush3.bf16.msra.mxu1 %v2773_v14 }
 0x576   :  { %2775 = vmatprep.subr.bf16.mxu1 %v4264_v3 }
 0x614   :  { %v1841_v44 = vpop.f32.mrb[34].mxu0 }
 0x615   :  { %v1865_v28 = vmul.f32 %v1841_v44, %v3947_v27  ;;  %v2659_v25 = vpop.f32.mrb[35].mxu0  ;;  %v1916_v27 = vmul.f32 %v2909_v5, %v4275_v34 }
 0x617   :  { %v1880_v42 = vadd.f32 %v1875_v26, %v1865_v28 }
 0x618   :  { %v1846_v58 = vpop.f32.mrb[36].mxu0 }
 0x619   :  { %v1866_v60 = vmul.f32 %v1846_v58, %v3949_v49  ;;  %v2662_v46 = vpop.f32.mrb[37].mxu0  ;;  %v3999_v17 = vmul.f32 %v1915_v10, %v1880_v42 }
 0x61b   :  { %v1881_v19 = vadd.f32 %v1876_v22, %v1866_v60  ;;  %v1925_v24 = vmul.f32 %v3999_v17, %v3999_v17 }
 0x61c   :  { %v1851_v18 = vpop.f32.mrb[38].mxu0 }
 0x61d   :  { %v1867_v1 = vmul.f32 %v1851_v18, %v3951_v36  ;;  %v2665_v30 = vpop.f32.mrb[39].mxu0  ;;  %v1930_v49 = vsel %vm1631_vm1, %v1925_v24, 0.0  ;;  %v4007_v2 = vmul.f32 %v1916_v27, %v1881_v19  ;;  %v1878_v36 = vmul.f32 %v2397_v29, %v3810_v48  ;;  %v2403_v27 = vld [vmem:[%s4145_s8 + $0x5] ss:$0 sm:$0xff] }
 0x61e   :  { %1931 = vadd.xlane.f32.xlu1 %v1930_v49 }
 0x61f   :  { %v1882_v52 = vadd.f32 %v1877_v16, %v1867_v1  ;;  %v1926_v6 = vmul.f32 %v4007_v2, %v4007_v2 }
 0x620   :  { %v1856_v53 = vpop.f32.mrb[40].mxu0 }
 0x621   :  { %v1868_v9 = vmul.f32 %v1856_v53, %v3955_v11  ;;  %v2668_v63 = vpop.f32.mrb[41].mxu0  ;;  %v1933_v55 = vsel %vm1631_vm1, %v1926_v6, 0.0  ;;  %v4015_v54 = vmul.f32 %v1917_v31, %v1882_v52  ;;  %v1879_v11 = vmul.f32 %v2397_v29, %v3817_v56  ;;  %v1983_v29 = vld [vmem:[%s4148_s6 + $0x30] sm:$0xff] }
 0x622   :  { %1934 = vadd.xlane.f32.xlu0 %v1933_v55  ;;  %v2776_v45 = vpack.c.bf16 %v1984_v13, %v1983_v29 }
 0x623   :  { %v1883_v8 = vadd.f32 %v1878_v36, %v1868_v9  ;;  %v1927_v62 = vmul.f32 %v4015_v54, %v4015_v54 }
 0x624   :  { %v1861_v4 = vpop.f32.mrb[42].mxu0  ;;  %2777 = vmatpush3.bf16.msra.mxu1 %v2776_v45 }
 0x625   :  { %v1869_v57 = vmul.f32 %v1861_v4, %v3958_v15  ;;  %v2671_v34 = vpop.f32.mrb[43].mxu0  ;;  %v1936_v48 = vsel %vm1631_vm1, %v1927_v62, 0.0  ;;  %v4023_v12 = vmul.f32 %v1918_v47, %v1883_v8 }
 0x626   :  { %1937 = vadd.xlane.f32.xlu0 %v1936_v48 }
 0x627   :  { %v1884_v20 = vadd.f32 %v1879_v11, %v1869_v57  ;;  %v1928_v43 = vmul.f32 %v4023_v12, %v4023_v12 }
 0x629   :  { %v1939_v35 = vsel %vm1631_vm1, %v1928_v43, 0.0  ;;  %v4029_v21 = vmul.f32 %v1919_v23, %v1884_v20 }
 0x62a   :  { %1940 = vadd.xlane.f32.xlu1 %v1939_v35 }
 0x62b   :  { %v1929_v56 = vmul.f32 %v4029_v21, %v4029_v21 }
 0x62d   :  { %v1943_v15 = vsel %vm1942_vm8, %v1929_v56, 0.0 }
 0x62e   :  { %1944 = vadd.xlane.f32.xlu0 %v1943_v15 }
 0x6ab   :  { %v1932_v44 = vpop.xlane.xlu1 %1931 }
 0x6ac   :  { %v1947_v28 = vmul.f32 0.015625, %v1932_v44 }
 0x6ae   :  { %v1952_v26 = vadd.f32 1e-05, %v1947_v28 }
 0x6af   :  { %v1935_v25 = vpop.xlane.xlu0 %1934 }
 0x6b0   :  { %2916 = vrsqrt.f32 %v1952_v26  ;;  %v1948_v37 = vmul.f32 0.015625, %v1935_v25 }
 0x6b2   :  { %v1953_v10 = vadd.f32 1e-05, %v1948_v37 }
 0x6b3   :  { %v1938_v42 = vpop.xlane.xlu0 %1937 }
 0x6b4   :  { %2918 = vrsqrt.f32 %v1953_v10  ;;  %v1949_v5 = vmul.f32 0.015625, %v1938_v42 }
 0x6b6   :  { %v1954_v58 = vadd.f32 1e-05, %v1949_v5 }
 0x6b7   :  { %v1941_v60 = vpop.xlane.xlu1 %1940 }
 0x6b8   :  { %2920 = vrsqrt.f32 %v1954_v58  ;;  %v1950_v22 = vmul.f32 0.015625, %v1941_v60  ;;  %v2177_v60 = vld [vmem:[%s4149_s7] sm:$0xff] }
 0x6ba   :  { %v2917_v46 = vpop.eup %2916  ;;  %v1955_v19 = vadd.f32 1e-05, %v1950_v22  ;;  %v2178_v22 = vld [vmem:[%s4149_s7 + $0x8] sm:$0xff] }
 0x6bb   :  { %v1962_v24 = vmul.f32 %v2917_v46, %v3999_v17  ;;  %v1945_v50 = vpop.xlane.xlu0 %1944  ;;  %v2179_v46 = vld [vmem:[%s4149_s7 + $0x10] sm:$0xff] }
 0x6bc   :  { %2922 = vrsqrt.f32 %v1955_v19  ;;  %v1951_v18 = vmul.f32 0.015625, %v1945_v50  ;;  %v2180_v19 = vld [vmem:[%s4149_s7 + $0x18] sm:$0xff] }
 0x6bd   :  { %v1972_v1 = vmul.f32 %v2403_v27, %v1962_v24  ;;  %v2782_v24 = vpack.c.bf16 %v2180_v19, %v2179_v46 }
 0x6be   :  { %v2919_v16 = vpop.eup %2918  ;;  %v1956_v30 = vadd.f32 1e-05, %v1951_v18 }
 0x6bf   :  { %2689 = vmatmul.mubr.msk.f32.vlgmr.msra.gmra.mrb[42].mxu1 %vm1631_vm1, %v1972_v1  ;;  %v1963_v49 = vmul.f32 %v2919_v16, %v4007_v2 }
 0x6c0   :  { %2924 = vrsqrt.f32 %v1956_v30  ;;  %2691 = vmatprep.mubr.msk.f32.mxu1 %vm2937_vm0, %v4268_v7 }
 0x6c1   :  { %v1973_v31 = vmul.f32 %v2403_v27, %v1963_v49 }
 0x6c2   :  { %v2921_v52 = vpop.eup %2920 }
 0x6c3   :  { %2692 = vmatmul.mubr.msk.f32.gmra.mrb[44].mxu1 %vm1631_vm1, %v1973_v31  ;;  %v1964_v17 = vmul.f32 %v2921_v52, %v4015_v54 }
 0x6c4   :  { %2694 = vmatprep.mubr.msk.f32.mxu1 %vm2937_vm0, %v4268_v7 }
 0x6c5   :  { %v1974_v6 = vmul.f32 %v2403_v27, %v1964_v17 }
 0x6c6   :  { %v2923_v59 = vpop.eup %2922 }
 0x6c7   :  { %2695 = vmatmul.mubr.msk.f32.gmra.mrb[46].mxu1 %vm1631_vm1, %v1974_v6  ;;  %v1965_v53 = vmul.f32 %v2923_v59, %v4023_v12 }
 0x6c8   :  { %2697 = vmatprep.mubr.msk.f32.mxu1 %vm2937_vm0, %v4268_v7 }
 0x6c9   :  { %v1975_v2 = vmul.f32 %v2403_v27, %v1965_v53 }
 0x6ca   :  { %v2925_v9 = vpop.eup %2924 }
 0x6cb   :  { %2698 = vmatmul.mubr.msk.f32.gmra.mrb[48].mxu1 %vm1631_vm1, %v1975_v2  ;;  %v1966_v36 = vmul.f32 %v2925_v9, %v4029_v21 }
 0x6cc   :  { %2700 = vmatprep.mubr.msk.f32.mxu1 %vm2937_vm0, %v4268_v7 }
 0x6cd   :  { %v1976_v63 = vmul.f32 %v2403_v27, %v1966_v36  ;;  %v2779_v27 = vpack.c.bf16 %v2178_v22, %v2177_v60 }
 0x6cf   :  { %2701 = vmatmul.mubr.msk.f32.gmra.mrb[50].mxu1 %vm1631_vm1, %v1976_v63  ;;  %2780 = vmatpush3.bf16.msra.mxu0 %v2779_v27  ;;  %v2410_v63 = vld [vmem:[%s4145_s8 + $0x7] ss:$0 sm:$0xff] }
 0x6d0   :  { %2781 = vmatprep.subr.bf16.mxu0 %v4264_v3  ;;  %v2409_v3 = vld [vmem:[%s4145_s8 + $0x6] ss:$0 sm:$0xff] }
 0x6d3   :  { %2783 = vmatpush3.bf16.msra.mxu0 %v2782_v24 }
 0x792   :  { %v2066_v55 = vpop.f32.mrb[42].mxu1 }
 0x793   :  { %v2690_v54 = vpop.f32.mrb[43].mxu1  ;;  %v2090_v47 = vsel %vm334_vm14, %v2066_v55, 0.0 }
 0x794   :  { %2091 = vadd.xlane.f32.xlu1 %v2090_v47 }
 0x796   :  { %v2071_v8 = vpop.f32.mrb[44].mxu1 }
 0x797   :  { %v2693_v62 = vpop.f32.mrb[45].mxu1  ;;  %v2093_v33 = vsel %vm334_vm14, %v2071_v8, 0.0 }
 0x798   :  { %2094 = vadd.xlane.f32.xlu0 %v2093_v33 }
 0x79a   :  { %v2076_v4 = vpop.f32.mrb[46].mxu1 }
 0x79b   :  { %v2696_v57 = vpop.f32.mrb[47].mxu1  ;;  %v2096_v11 = vsel %vm334_vm14, %v2076_v4, 0.0 }
 0x79c   :  { %2097 = vadd.xlane.f32.xlu1 %v2096_v11 }
 0x79e   :  { %v2081_v34 = vpop.f32.mrb[48].mxu1 }
 0x79f   :  { %v2699_v48 = vpop.f32.mrb[49].mxu1  ;;  %v2099_v12 = vsel %vm334_vm14, %v2081_v34, 0.0 }
 0x7a0   :  { %2100 = vadd.xlane.f32.xlu0 %v2099_v12 }
 0x7a2   :  { %v2086_v23 = vpop.f32.mrb[50].mxu1 }
 0x7a3   :  { %v2702_v20 = vpop.f32.mrb[51].mxu1  ;;  %v2103_v43 = vsel %vm2102_vm11, %v2086_v23, 0.0 }
 0x7a4   :  { %2104 = vadd.xlane.f32.xlu1 %v2103_v43 }
 0x821   :  { %v2092_v35 = vpop.xlane.xlu1 %2091 }
 0x822   :  { %v2107_v21 = vmul.f32 0.03125, %v2092_v35 }
 0x824   :  { %v2112_v56 = vsub.f32 %v2066_v55, %v2107_v21 }
 0x825   :  { %v2095_v15 = vpop.xlane.xlu0 %2094 }
 0x826   :  { %v2108_v39 = vmul.f32 0.03125, %v2095_v15  ;;  %v2117_v41 = vmul.f32 %v2112_v56, %v2112_v56 }
 0x828   :  { %v2113_v0 = vsub.f32 %v2071_v8, %v2108_v39  ;;  %v2122_v40 = vsel %vm334_vm14, %v2117_v41, 0.0  ;;  %v2411_v41 = vld [vmem:[%s4145_s8 + $0x8] ss:$0 sm:$0xff] }
 0x829   :  { %v2098_v61 = vpop.xlane.xlu1 %2097  ;;  %2123 = vadd.xlane.f32.xlu0 %v2122_v40 }
 0x82a   :  { %v2109_v32 = vmul.f32 0.03125, %v2098_v61  ;;  %v2118_v38 = vmul.f32 %v2113_v0, %v2113_v0 }
 0x82c   :  { %v2114_v51 = vsub.f32 %v2076_v4, %v2109_v32  ;;  %v2125_v14 = vsel %vm334_vm14, %v2118_v38, 0.0 }
 0x82d   :  { %2126 = vadd.xlane.f32.xlu1 %v2125_v14  ;;  %v2101_v29 = vpop.xlane.xlu0 %2100 }
 0x82e   :  { %v2110_v13 = vmul.f32 0.03125, %v2101_v29  ;;  %v2119_v45 = vmul.f32 %v2114_v51, %v2114_v51 }
 0x830   :  { %v2115_v44 = vsub.f32 %v2081_v34, %v2110_v13  ;;  %v2128_v28 = vsel %vm334_vm14, %v2119_v45, 0.0 }
 0x831   :  { %2129 = vadd.xlane.f32.xlu0 %v2128_v28  ;;  %v2105_v26 = vpop.xlane.xlu1 %2104 }
 0x832   :  { %v2111_v25 = vmul.f32 0.03125, %v2105_v26  ;;  %v2120_v37 = vmul.f32 %v2115_v44, %v2115_v44 }
 0x834   :  { %v2116_v10 = vsub.f32 %v2086_v23, %v2111_v25  ;;  %v2131_v42 = vsel %vm334_vm14, %v2120_v37, 0.0 }
 0x835   :  { %2132 = vadd.xlane.f32.xlu1 %v2131_v42 }
 0x836   :  { %v2121_v5 = vmul.f32 %v2116_v10, %v2116_v10 }
 0x838   :  { %v2134_v58 = vsel %vm2102_vm11, %v2121_v5, 0.0 }
 0x839   :  { %2135 = vadd.xlane.f32.xlu0 %v2134_v58 }
 0x8b6   :  { %v2124_v50 = vpop.xlane.xlu0 %2123 }
 0x8b7   :  { %v2137_v18 = vmul.f32 0.03125, %v2124_v50 }
 0x8b9   :  { %v2142_v1 = vadd.f32 1e-05, %v2137_v18 }
 0x8ba   :  { %v2127_v16 = vpop.xlane.xlu1 %2126 }
 0x8bb   :  { %2926 = vrsqrt.f32 %v2142_v1  ;;  %v2138_v30 = vmul.f32 0.03125, %v2127_v16 }
 0x8bd   :  { %v2143_v49 = vadd.f32 1e-05, %v2138_v30 }
 0x8be   :  { %v2130_v31 = vpop.xlane.xlu0 %2129 }
 0x8bf   :  { %2928 = vrsqrt.f32 %v2143_v49  ;;  %v2139_v52 = vmul.f32 0.03125, %v2130_v31 }
 0x8c1   :  { %v2144_v17 = vadd.f32 1e-05, %v2139_v52 }
 0x8c2   :  { %v2133_v6 = vpop.xlane.xlu1 %2132 }
 0x8c3   :  { %2930 = vrsqrt.f32 %v2144_v17  ;;  %v2140_v59 = vmul.f32 0.03125, %v2133_v6 }
 0x8c5   :  { %v2927_v53 = vpop.eup %2926  ;;  %v2145_v2 = vadd.f32 1e-05, %v2140_v59 }
 0x8c6   :  { %v2152_v9 = vmul.f32 %v2927_v53, %v2112_v56  ;;  %v2136_v36 = vpop.xlane.xlu0 %2135 }
 0x8c7   :  { %2932 = vrsqrt.f32 %v2145_v2  ;;  %v2141_v55 = vmul.f32 0.03125, %v2136_v36 }
 0x8c8   :  { %v2162_v54 = vmul.f32 %v2409_v3, %v2152_v9 }
 0x8c9   :  { %v2929_v47 = vpop.eup %2928  ;;  %v2146_v8 = vadd.f32 1e-05, %v2141_v55 }
 0x8ca   :  { %v2172_v62 = vadd.f32 %v2410_v63, %v2162_v54  ;;  %v2153_v33 = vmul.f32 %v2929_v47, %v2113_v0 }
 0x8cb   :  { %2934 = vrsqrt.f32 %v2146_v8 }
 0x8cc   :  { %2712 = vmatmul.mubr.msk.f32.vlgmr.msra.gmra.mrb[44].mxu0 %vm334_vm14, %v2172_v62  ;;  %v2163_v4 = vmul.f32 %v2409_v3, %v2153_v33 }
 0x8cd   :  { %v2931_v57 = vpop.eup %2930  ;;  %2714 = vmatprep.mubr.msk.f32.mxu0 %vm2937_vm0, %v4268_v7 }
 0x8ce   :  { %v2173_v11 = vadd.f32 %v2410_v63, %v2163_v4  ;;  %v2154_v34 = vmul.f32 %v2931_v57, %v2114_v51 }
 0x8d0   :  { %2715 = vmatmul.mubr.msk.f32.gmra.mrb[46].mxu0 %vm334_vm14, %v2173_v11  ;;  %v2164_v48 = vmul.f32 %v2409_v3, %v2154_v34 }
 0x8d1   :  { %v2933_v12 = vpop.eup %2932  ;;  %2717 = vmatprep.mubr.msk.f32.mxu0 %vm2937_vm0, %v4268_v7 }
 0x8d2   :  { %v2174_v23 = vadd.f32 %v2410_v63, %v2164_v48  ;;  %v2155_v20 = vmul.f32 %v2933_v12, %v2115_v44 }
 0x8d4   :  { %2718 = vmatmul.mubr.msk.f32.gmra.mrb[48].mxu0 %vm334_vm14, %v2174_v23  ;;  %v2165_v43 = vmul.f32 %v2409_v3, %v2155_v20 }
 0x8d5   :  { %v2935_v35 = vpop.eup %2934  ;;  %2720 = vmatprep.mubr.msk.f32.mxu0 %vm2937_vm0, %v4268_v7 }
 0x8d6   :  { %v2175_v21 = vadd.f32 %v2410_v63, %v2165_v43  ;;  %v2156_v56 = vmul.f32 %v2935_v35, %v2116_v10 }
 0x8d8   :  { %2721 = vmatmul.mubr.msk.f32.gmra.mrb[50].mxu0 %vm334_vm14, %v2175_v21  ;;  %v2166_v15 = vmul.f32 %v2409_v3, %v2156_v56 }
 0x8d9   :  { %2723 = vmatprep.mubr.msk.f32.mxu0 %vm2937_vm0, %v4268_v7  ;;  %vm2296_vm0 = vcmask 123904  }
 0x8da   :  { %v2176_v39 = vadd.f32 %v2410_v63, %v2166_v15 }
 0x8dc   :  { %2724 = vmatmul.mubr.msk.f32.gmra.mrb[52].mxu0 %vm334_vm14, %v2176_v39 }
 0x99f   :  { %v2267_v0 = vpop.f32.mrb[44].mxu0 }
 0x9a0   :  { %v2268_v40 = vadd.f32 %v2411_v41, %v2267_v0  ;;  %v2713_v61 = vpop.f32.mrb[45].mxu0 }
 0x9a2   :  { %2292 = vst.msk [vmem:[%s4150_s9] sm:$0xff] %vm2291_vm3, %v2268_v40 }
 0x9a3   :  { %v2272_v32 = vpop.f32.mrb[46].mxu0 }
 0x9a4   :  { %v2273_v38 = vadd.f32 %v2411_v41, %v2272_v32  ;;  %v2716_v51 = vpop.f32.mrb[47].mxu0 }
 0x9a6   :  { %2293 = vst.msk [vmem:[%s4150_s9 + $0x8] sm:$0xff] %vm2291_vm3, %v2273_v38 }
 0x9a7   :  { %v2277_v7 = vpop.f32.mrb[48].mxu0 }
 0x9a8   :  { %v2278_v14 = vadd.f32 %v2411_v41, %v2277_v7  ;;  %v2719_v29 = vpop.f32.mrb[49].mxu0 }
 0x9aa   :  { %2294 = vst.msk [vmem:[%s4150_s9 + $0x10] sm:$0xff] %vm2291_vm3, %v2278_v14 }
 0x9ab   :  { %v2282_v13 = vpop.f32.mrb[50].mxu0 }
 0x9ac   :  { %v2283_v45 = vadd.f32 %v2411_v41, %v2282_v13  ;;  %v2722_v44 = vpop.f32.mrb[51].mxu0 }
 0x9ae   :  { %2295 = vst.msk [vmem:[%s4150_s9 + $0x18] sm:$0xff] %vm2291_vm3, %v2283_v45 }
 0x9af   :  { %v2287_v28 = vpop.f32.mrb[52].mxu0 }
 0x9b0   :  { %v2288_v26 = vadd.f32 %v2411_v41, %v2287_v28  ;;  %v2725_v25 = vpop.f32.mrb[53].mxu0 }
 0x9b2   :  { %2297 = vst.msk [vmem:[%s4150_s9 + $0x20] sm:$0x3] %vm2296_vm0, %v2288_v26 }

</bundles_post_ra>
